<compile_context>
chip_gen: v5e
topology: v5e:2x2
jax: 0.10.0
libtpu: 0.0.40
codegen_flags: <defaults>
</compile_context>

<pallas_src>
import functools

import numpy as np
import jax
import jax.numpy as jnp
from jax import lax
from jax.experimental import pallas as pl
from jax.experimental.pallas import tpu as pltpu


def _round_up(x, m):
    return (x + m - 1) // m * m


# ---------------------------------------------------------------------------
# Pallas kernel: one fuse layer per grid step (grid = (4,), "arbitrary").
# ---------------------------------------------------------------------------
def m2m_kernel(feat_ref, adj_hbm, w_cat_ref, w_ctr2_ref,
               g1_ref, b1_ref, g2_ref, b2_ref,
               out_ref, adj_sc, copy_sem, *, d_real, eps=1e-5):
    n_pad, d_pad = out_ref.shape
    n_edge = adj_sc.shape[0]            # pre0, pre1, suc0, suc1, left, right
    i = pl.program_id(0)
    inv_d = 1.0 / d_real                # GN stats over REAL channels only

    # ---- one-time setup: f32 carry in out_ref + resident bf16 adjacency ----
    # (adjacency comes from HBM once, into a SINGLE VMEM buffer -> no 2x
    #  double-buffer of the dominant tensor)
    @pl.when(i == 0)
    def _():
        out_ref[...] = feat_ref[...]
        cp = pltpu.make_async_copy(adj_hbm, adj_sc, copy_sem.at[0])
        cp.start()
        cp.wait()

    # Channel mask excluding zero-padded channels from the GN statistics.
    if d_pad == d_real:
        ch_mask = None
    else:
        ch_mask = (lax.broadcasted_iota(jnp.int32, (1, d_pad), 1)
                   < d_real).astype(jnp.float32)

    def group_norm(x, gamma, beta):
        # nn.GroupNorm(1, C): per-row mean / biased var, two-pass form.
        mu = jnp.sum(x, axis=-1, keepdims=True) * inv_d
        diff = x - mu
        if ch_mask is not None:
            diff = diff * ch_mask       # padded channels contribute 0 to var
        var = jnp.sum(diff * diff, axis=-1, keepdims=True) * inv_d
        return diff * lax.rsqrt(var + eps) * gamma + beta

    res = out_ref[...]                      # f32 residual / layer carry
    feat_bf = res.astype(jnp.bfloat16)      # bf16 MXU inputs, f32 accumulation

    # ---- one wide bf16 MXU matmul: feat @ [W_ctr | W_pre0 | ... | W_right] --
    msgs = jnp.dot(feat_bf, w_cat_ref[0], preferred_element_type=jnp.float32)
    temp = msgs[:, :d_pad]                  # 'ctr' contribution (kept f32)

    # ---- six index_add_ calls == six bf16 adjacency matmuls (f32 acc) -------
    # (column cuts at multiples of 128 -> lane-aligned static slices)
    for e in range(n_edge):
        m_e = msgs[:, (e + 1) * d_pad:(e + 2) * d_pad].astype(jnp.bfloat16)
        temp = temp + jnp.dot(adj_sc[e], m_e,
                              preferred_element_type=jnp.float32)

    # ---- GN -> ReLU -> ctr2 Linear -> GN -> +res -> ReLU --------------------
    x = jnp.maximum(group_norm(temp, g1_ref[0], b1_ref[0]), 0.0)
    x = jnp.dot(x.astype(jnp.bfloat16), w_ctr2_ref[0],
                preferred_element_type=jnp.float32)
    x = group_norm(x, g2_ref[0], b2_ref[0])
    out_ref[...] = jnp.maximum(x + res, 0.0)


# ---------------------------------------------------------------------------
# Wrapper: padding, weight/adjacency packing, pallas_call.
# ---------------------------------------------------------------------------
def m2m_pallas(feat, adj, params, n_layers=4):
    w_ctr, w_edge, g_norm, b_norm, w_ctr2, g_ctr2, b_ctr2 = params
    E, N, _ = adj.shape
    D = feat.shape[1]
    L = n_layers
    # bf16 sublane packing wants node-rows in multiples of 16; once the graph
    # is at least a lane wide, make the adjacency lane (= MXU contraction) dim
    # a clean multiple of 128 so the MXU sees unmasked K tiles.
    n_pad = _round_up(N, 128 if N >= 128 else 16)
    d_pad = _round_up(D, 128)
    f32, bf16 = jnp.float32, jnp.bfloat16

    # bf16 stores integer edge counts exactly only below 256.
    try:
        max_mult = float(jnp.max(adj))
    except Exception:          # traced: caller guarantees the bound
        max_mult = 0.0
    assert max_mult < 256.0, "bf16 adjacency needs per-(u,v,type) count < 256"

    # ---- zero-pad to aligned tiles (padding is provably inert, see header) --
    feat_p = jnp.zeros((n_pad, d_pad), f32).at[:N, :D].set(feat)

    def pad_w(w):  # [D, D] -> [d_pad, d_pad]
        return jnp.zeros((d_pad, d_pad), f32).at[:D, :D].set(w)

    # W_cat[i] = [W_ctr_i | W_edge_{i,0} | ... | W_edge_{i,E-1}]  (bf16)
    w_cat = jnp.stack([
        jnp.concatenate([pad_w(w_ctr[i])]
                        + [pad_w(w_edge[i * E + e]) for e in range(E)], axis=1)
        for i in range(L)]).astype(bf16)                 # [L, d_pad, 7*d_pad]
    w_ctr2_p = jnp.stack([pad_w(w_ctr2[i]) for i in range(L)]).astype(bf16)

    def pad_gn(g):  # [L, D] -> [L, 1, d_pad]  (zero pad -> padded chans stay 0)
        return jnp.zeros((L, 1, d_pad), f32).at[:, 0, :D].set(g)

    g1, b1 = pad_gn(g_norm), pad_gn(b_norm)
    g2, b2 = pad_gn(g_ctr2), pad_gn(b_ctr2)

    # [E, n_pad, n_pad] bf16 count adjacency (exact), kept 3-D so each edge
    # type is one clean [n_pad, n_pad] @ [n_pad, d_pad] MXU matmul.
    adj_p = (jnp.zeros((E, n_pad, n_pad), f32)
             .at[:, :N, :N].set(adj)).astype(bf16)

    # ---- VMEM budget capped at the actual device capacity (v7x: 64 MiB) -----
    try:
        vmem_cap = int(pltpu.get_tpu_info().vmem_capacity_bytes)
    except Exception:
        vmem_cap = 64 * 1024 * 1024                     # conservative (v7x)
    resident = (4 * n_pad * d_pad * 4                   # feat in + out blocks
                + E * n_pad * n_pad * 2)                # bf16 adjacency (x1)
    per_layer = ((E + 2) * d_pad * d_pad * 2            # W_cat + W_ctr2 (bf16)
                 + 4 * d_pad * 4)                       # GN affine blocks
    temps = (E + 3) * n_pad * d_pad * 4                 # live f32 msgs/temp/x
    vmem_limit = int(min(vmem_cap,
                         max(resident + 2 * per_layer + temps + (4 << 20),
                             32 * 1024 * 1024)))

    flops = L * (2 * n_pad * d_pad * (E + 1) * d_pad    # fused wide linear
                 + 2 * E * n_pad * n_pad * d_pad        # adjacency applies
                 + 2 * n_pad * d_pad * d_pad)           # ctr2 linear
    inputs = (feat_p, adj_p, w_cat, w_ctr2_p, g1, b1, g2, b2)
    bytes_accessed = int(sum(int(a.size) * a.dtype.itemsize for a in inputs)
                         + n_pad * d_pad * 4)

    kernel = functools.partial(m2m_kernel, d_real=D)
    out_p = pl.pallas_call(
        kernel,
        out_shape=jax.ShapeDtypeStruct((n_pad, d_pad), f32),
        grid_spec=pltpu.PrefetchScalarGridSpec(
            num_scalar_prefetch=0,
            grid=(L,),                                   # 4 fuse layers
            in_specs=[
                pl.BlockSpec((n_pad, d_pad), lambda i: (0, 0)),  # feat (read once)
                pl.BlockSpec(memory_space=pl.ANY),               # adjacency in HBM
                pl.BlockSpec((1, d_pad, (E + 1) * d_pad), lambda i: (i, 0, 0)),
                pl.BlockSpec((1, d_pad, d_pad), lambda i: (i, 0, 0)),
                pl.BlockSpec((1, 1, d_pad), lambda i: (i, 0, 0)),  # gamma1[i]
                pl.BlockSpec((1, 1, d_pad), lambda i: (i, 0, 0)),  # beta1[i]
                pl.BlockSpec((1, 1, d_pad), lambda i: (i, 0, 0)),  # gamma2[i]
                pl.BlockSpec((1, 1, d_pad), lambda i: (i, 0, 0)),  # beta2[i]
            ],
            out_specs=pl.BlockSpec((n_pad, d_pad), lambda i: (0, 0)),
            scratch_shapes=[
                pltpu.VMEM((E, n_pad, n_pad), bf16),   # resident bf16 adjacency
                pltpu.SemaphoreType.DMA((1,)),         # one-time adjacency DMA
            ],
        ),
        compiler_params=pltpu.CompilerParams(
            dimension_semantics=("arbitrary",),        # layers are sequential
            vmem_limit_bytes=vmem_limit),
        cost_estimate=pl.CostEstimate(
            flops=flops, transcendentals=L * 2 * n_pad,
            bytes_accessed=bytes_accessed),
    )(*inputs)

    # TODO(synk): at real LaneGCN sizes (N in the thousands) the dense
    # [E, N, N] bf16 adjacency exceeds v7x's 64 MiB VMEM: keep feat and the
    # per-layer msgs resident, leave adj in HBM and stream u-row tiles with a
    # 2-3 deep double-buffered pltpu.make_async_copy / pltpu.emit_pipeline,
    # accumulating temp per row tile; add a "parallel" row-tile grid axis (or
    # pl.core_map over a TensorCore mesh) so v7x's two TCs split the rows.
    return out_p[:N, :D]


# ---------------------------------------------------------------------------
# Pure-JAX f32 reference using true index_add semantics (mirrors PyTorch code)
# ---------------------------------------------------------------------------
def m2m_reference(feat, edges_u, edges_v, params, n_layers=4):
    w_ctr, w_edge, g_norm, b_norm, w_ctr2, g_ctr2, b_ctr2 = params
    n_edge = len(edges_u)

    def gn(x, gamma, beta, eps=1e-5):
        mu = jnp.mean(x, axis=-1, keepdims=True)
        var = jnp.mean((x - mu) ** 2, axis=-1, keepdims=True)
        return (x - mu) * lax.rsqrt(var + eps) * gamma + beta

    res = feat
    for i in range(n_layers):
        temp = feat @ w_ctr[i]
        for e in range(n_edge):
            msg = feat[edges_v[e]] @ w_edge[i * n_edge + e]
            temp = temp.at[edges_u[e]].add(msg)
        x = jnp.maximum(gn(temp, g_norm[i], b_norm[i]), 0.0)
        x = gn(x @ w_ctr2[i], g_ctr2[i], b_ctr2[i])
        x = jnp.maximum(x + res, 0.0)
        feat = x
        res = x
    return feat


# ---------------------------------------------------------------------------
# Main: deterministic synthetic params / graph, run kernel, verify.
# ---------------------------------------------------------------------------
if __name__ == "__main__":
    key = jax.random.PRNGKey(0)

    N_NODE = 16          # number of lane nodes
    N_MAP = 32           # feature dim (n_map; 128 in the real model)
    NUM_SCALES = 2       # pre0, pre1, suc0, suc1
    N_LAYERS = 4
    N_EDGE_TYPES = 2 * NUM_SCALES + 2   # pre*/suc* + left + right
    N_EDGES = 24         # edges per type

    keys = jax.random.split(key, 12)

    # Node features.
    feat = jax.random.normal(keys[0], (N_NODE, N_MAP), dtype=jnp.float32)

    # Graph: per edge type, (u, v) lists -> dense count adjacency so that
    # index_add_ becomes a matmul (exact, including repeated indices).
    edges_u, edges_v = [], []
    adj = jnp.zeros((N_EDGE_TYPES, N_NODE, N_NODE), dtype=jnp.float32)
    for e in range(N_EDGE_TYPES):
        ku, kv = jax.random.split(jax.random.fold_in(keys[1], e))
        u = jax.random.randint(ku, (N_EDGES,), 0, N_NODE)
        v = jax.random.randint(kv, (N_EDGES,), 0, N_NODE)
        edges_u.append(u)
        edges_v.append(v)
        adj = adj.at[e, u, v].add(1.0)

    # Parameters (deterministic synthetic init). Linear weights stored [in, out]
    # so the kernel does feat @ W (== feat @ W_torch.T).
    scale = 1.0 / np.sqrt(N_MAP)
    w_ctr = scale * jax.random.normal(keys[2], (N_LAYERS, N_MAP, N_MAP), jnp.float32)
    w_edge = scale * jax.random.normal(
        keys[3], (N_LAYERS * N_EDGE_TYPES, N_MAP, N_MAP), jnp.float32)
    w_ctr2 = scale * jax.random.normal(keys[4], (N_LAYERS, N_MAP, N_MAP), jnp.float32)
    g_norm = 1.0 + 0.1 * jax.random.normal(keys[5], (N_LAYERS, N_MAP), jnp.float32)
    b_norm = 0.1 * jax.random.normal(keys[6], (N_LAYERS, N_MAP), jnp.float32)
    g_ctr2 = 1.0 + 0.1 * jax.random.normal(keys[7], (N_LAYERS, N_MAP), jnp.float32)
    b_ctr2 = 0.1 * jax.random.normal(keys[8], (N_LAYERS, N_MAP), jnp.float32)

    params = (w_ctr, w_edge, g_norm, b_norm, w_ctr2, g_ctr2, b_ctr2)

    # Run the Pallas kernel.
    out = m2m_pallas(feat, adj, params, n_layers=N_LAYERS)
    out = jax.block_until_ready(out)

    # Check against the f32 index_add-based reference.  The kernel feeds the
    # MXU bf16 operands (f32 accumulation, f32 residual carry) across 4 fused
    # layers, so tolerance is relaxed to bf16-level.
    ref = m2m_reference(feat, edges_u, edges_v, params, n_layers=N_LAYERS)
    np.testing.assert_allclose(np.asarray(out), np.asarray(ref),
                               rtol=1e-1, atol=1e-1)

    print("KERNEL_OK")
</pallas_src>

<mosaic_0001>
module attributes {stable_mosaic.version = 11 : i64} {
  func.func @m2m_kernel(%arg0: i32, %arg1: memref<16x128xf32, #tpu.memory_space<vmem>>, %arg2: memref<6x16x16xbf16, #tpu.memory_space<any>>, %arg3: memref<1x128x896xbf16, #tpu.memory_space<vmem>>, %arg4: memref<1x128x128xbf16, #tpu.memory_space<vmem>>, %arg5: memref<1x1x128xf32, #tpu.memory_space<vmem>>, %arg6: memref<1x1x128xf32, #tpu.memory_space<vmem>>, %arg7: memref<1x1x128xf32, #tpu.memory_space<vmem>>, %arg8: memref<1x1x128xf32, #tpu.memory_space<vmem>>, %arg9: memref<16x128xf32, #tpu.memory_space<vmem>>, %arg10: memref<6x16x16xbf16, #tpu.memory_space<vmem>>, %arg11: memref<1x!tpu.dma_semaphore, #tpu.memory_space<semaphore_mem>>) attributes {dimension_semantics = [#tpu.dimension_semantics<arbitrary>], iteration_bounds = array<i64: 4>, scalar_prefetch = 0 : i64, scratch_operands = 2 : i64, tpu.core_type = #tpu.core_type<tc>, window_params = [{pipeline_mode = #tpu.pipeline_mode<synchronous>, transform_indices = @transform_0, window_bounds = array<i64: 16, 128>}, {}, {transform_indices = @transform_2, window_bounds = array<i64: 1, 128, 896>}, {transform_indices = @transform_3, window_bounds = array<i64: 1, 128, 128>}, {transform_indices = @transform_4, window_bounds = array<i64: 1, 1, 128>}, {transform_indices = @transform_5, window_bounds = array<i64: 1, 1, 128>}, {transform_indices = @transform_6, window_bounds = array<i64: 1, 1, 128>}, {transform_indices = @transform_7, window_bounds = array<i64: 1, 1, 128>}, {pipeline_mode = #tpu.pipeline_mode<synchronous>, transform_indices = @transform_8, window_bounds = array<i64: 16, 128>}]} {
    %c0_i32 = arith.constant 0 : i32
    %0 = arith.cmpi eq, %arg0, %c0_i32 : i32
    %1 = arith.extui %0 : i1 to i32
    %c0_i32_0 = arith.constant 0 : i32
    %2 = arith.cmpi ne, %1, %c0_i32_0 : i32
    scf.if %2 {
      %c0_54 = arith.constant 0 : index
      %c0_55 = arith.constant 0 : index
      %112 = vector.load %arg1[%c0_54, %c0_55] : memref<16x128xf32, #tpu.memory_space<vmem>>, vector<16x128xf32>
      %c0_56 = arith.constant 0 : index
      %c0_57 = arith.constant 0 : index
      %113 = vector.load %arg9[%c0_56, %c0_57] : memref<16x128xf32, #tpu.memory_space<vmem>>, vector<16x128xf32>
      tpu.vector_store %arg9[%c0_56, %c0_57], %112 {strides = array<i32>} : memref<16x128xf32, #tpu.memory_space<vmem>>, vector<16x128xf32>,
      %c0_i32_58 = arith.constant 0 : i32
      %114 = tpu.memref_slice %arg11[%c0_i32_58] : memref<1x!tpu.dma_semaphore, #tpu.memory_space<semaphore_mem>> -> memref<1x!tpu.dma_semaphore, #tpu.memory_space<semaphore_mem>>
      %115 = tpu.memref_squeeze %114 : memref<1x!tpu.dma_semaphore, #tpu.memory_space<semaphore_mem>> -> memref<!tpu.dma_semaphore, #tpu.memory_space<semaphore_mem>>
      tpu.enqueue_dma source(%arg2 : memref<6x16x16xbf16, #tpu.memory_space<any>>) target(%arg10 : memref<6x16x16xbf16, #tpu.memory_space<vmem>>) target_semaphore(%115 : memref<!tpu.dma_semaphore, #tpu.memory_space<semaphore_mem>>)
      %c0_i32_59 = arith.constant 0 : i32
      %116 = tpu.memref_slice %arg11[%c0_i32_59] : memref<1x!tpu.dma_semaphore, #tpu.memory_space<semaphore_mem>> -> memref<1x!tpu.dma_semaphore, #tpu.memory_space<semaphore_mem>>
      %117 = tpu.memref_squeeze %116 : memref<1x!tpu.dma_semaphore, #tpu.memory_space<semaphore_mem>> -> memref<!tpu.dma_semaphore, #tpu.memory_space<semaphore_mem>>
      tpu.wait_dma2 semaphore(%117 : memref<!tpu.dma_semaphore, #tpu.memory_space<semaphore_mem>>) src(%arg2 : memref<6x16x16xbf16, #tpu.memory_space<any>>) dst(%arg10 : memref<6x16x16xbf16, #tpu.memory_space<vmem>>)
    } else {
    }
    %3 = tpu.iota {dimensions = array<i32: 1>} : vector<1x128xi32>
    %c32_i32 = arith.constant 32 : i32
    %4 = vector.broadcast %c32_i32 : i32 to vector<1x128xi32>
    %5 = arith.cmpi slt, %3, %4 : vector<1x128xi32>
    %6 = arith.extui %5 : vector<1x128xi1> to vector<1x128xi32>
    %7 = arith.sitofp %6 : vector<1x128xi32> to vector<1x128xf32>
    %c0 = arith.constant 0 : index
    %c0_1 = arith.constant 0 : index
    %8 = vector.load %arg9[%c0, %c0_1] : memref<16x128xf32, #tpu.memory_space<vmem>>, vector<16x128xf32>
    %9 = arith.truncf %8 : vector<16x128xf32> to vector<16x128xbf16>
    %c0_2 = arith.constant 0 : index
    %c0_3 = arith.constant 0 : index
    %c0_4 = arith.constant 0 : index
    %10 = vector.load %arg3[%c0_2, %c0_3, %c0_4] : memref<1x128x896xbf16, #tpu.memory_space<vmem>>, vector<1x128x896xbf16>
    %11 = vector.shape_cast %10 : vector<1x128x896xbf16> to vector<128x896xbf16>
    %cst = arith.constant dense<0.000000e+00> : vector<16x896xf32>
    %12 = tpu.matmul %9, %11, %cst {dimension_numbers = #tpu.dot_dimension_numbers<[1], [0], [0], [1], [0, 0, 1, 1], [], []>} : vector<16x128xbf16>, vector<128x896xbf16>, vector<16x896xf32> -> vector<16x896xf32>
    %13 = vector.extract_strided_slice %12 {offsets = [0, 0], sizes = [16, 128], strides = [1, 1]} : vector<16x896xf32> to vector<16x128xf32>
    %14 = vector.extract_strided_slice %12 {offsets = [0, 128], sizes = [16, 128], strides = [1, 1]} : vector<16x896xf32> to vector<16x128xf32>
    %15 = arith.truncf %14 : vector<16x128xf32> to vector<16x128xbf16>
    %c0_5 = arith.constant 0 : index
    %c0_6 = arith.constant 0 : index
    %c0_7 = arith.constant 0 : index
    %16 = vector.load %arg10[%c0_5, %c0_6, %c0_7] : memref<6x16x16xbf16, #tpu.memory_space<vmem>>, vector<1x16x16xbf16>
    %17 = vector.shape_cast %16 : vector<1x16x16xbf16> to vector<16x16xbf16>
    %cst_8 = arith.constant dense<0.000000e+00> : vector<16x128xf32>
    %18 = tpu.matmul %17, %15, %cst_8 {dimension_numbers = #tpu.dot_dimension_numbers<[1], [0], [0], [1], [0, 0, 1, 1], [], []>} : vector<16x16xbf16>, vector<16x128xbf16>, vector<16x128xf32> -> vector<16x128xf32>
    %19 = arith.addf %13, %18 : vector<16x128xf32>
    %20 = vector.extract_strided_slice %12 {offsets = [0, 256], sizes = [16, 128], strides = [1, 1]} : vector<16x896xf32> to vector<16x128xf32>
    %21 = arith.truncf %20 : vector<16x128xf32> to vector<16x128xbf16>
    %c1 = arith.constant 1 : index
    %c0_9 = arith.constant 0 : index
    %c0_10 = arith.constant 0 : index
    %22 = vector.load %arg10[%c1, %c0_9, %c0_10] : memref<6x16x16xbf16, #tpu.memory_space<vmem>>, vector<1x16x16xbf16>
    %23 = vector.shape_cast %22 : vector<1x16x16xbf16> to vector<16x16xbf16>
    %cst_11 = arith.constant dense<0.000000e+00> : vector<16x128xf32>
    %24 = tpu.matmul %23, %21, %cst_11 {dimension_numbers = #tpu.dot_dimension_numbers<[1], [0], [0], [1], [0, 0, 1, 1], [], []>} : vector<16x16xbf16>, vector<16x128xbf16>, vector<16x128xf32> -> vector<16x128xf32>
    %25 = arith.addf %19, %24 : vector<16x128xf32>
    %26 = vector.extract_strided_slice %12 {offsets = [0, 384], sizes = [16, 128], strides = [1, 1]} : vector<16x896xf32> to vector<16x128xf32>
    %27 = arith.truncf %26 : vector<16x128xf32> to vector<16x128xbf16>
    %c2 = arith.constant 2 : index
    %c0_12 = arith.constant 0 : index
    %c0_13 = arith.constant 0 : index
    %28 = vector.load %arg10[%c2, %c0_12, %c0_13] : memref<6x16x16xbf16, #tpu.memory_space<vmem>>, vector<1x16x16xbf16>
    %29 = vector.shape_cast %28 : vector<1x16x16xbf16> to vector<16x16xbf16>
    %cst_14 = arith.constant dense<0.000000e+00> : vector<16x128xf32>
    %30 = tpu.matmul %29, %27, %cst_14 {dimension_numbers = #tpu.dot_dimension_numbers<[1], [0], [0], [1], [0, 0, 1, 1], [], []>} : vector<16x16xbf16>, vector<16x128xbf16>, vector<16x128xf32> -> vector<16x128xf32>
    %31 = arith.addf %25, %30 : vector<16x128xf32>
    %32 = vector.extract_strided_slice %12 {offsets = [0, 512], sizes = [16, 128], strides = [1, 1]} : vector<16x896xf32> to vector<16x128xf32>
    %33 = arith.truncf %32 : vector<16x128xf32> to vector<16x128xbf16>
    %c3 = arith.constant 3 : index
    %c0_15 = arith.constant 0 : index
    %c0_16 = arith.constant 0 : index
    %34 = vector.load %arg10[%c3, %c0_15, %c0_16] : memref<6x16x16xbf16, #tpu.memory_space<vmem>>, vector<1x16x16xbf16>
    %35 = vector.shape_cast %34 : vector<1x16x16xbf16> to vector<16x16xbf16>
    %cst_17 = arith.constant dense<0.000000e+00> : vector<16x128xf32>
    %36 = tpu.matmul %35, %33, %cst_17 {dimension_numbers = #tpu.dot_dimension_numbers<[1], [0], [0], [1], [0, 0, 1, 1], [], []>} : vector<16x16xbf16>, vector<16x128xbf16>, vector<16x128xf32> -> vector<16x128xf32>
    %37 = arith.addf %31, %36 : vector<16x128xf32>
    %38 = vector.extract_strided_slice %12 {offsets = [0, 640], sizes = [16, 128], strides = [1, 1]} : vector<16x896xf32> to vector<16x128xf32>
    %39 = arith.truncf %38 : vector<16x128xf32> to vector<16x128xbf16>
    %c4 = arith.constant 4 : index
    %c0_18 = arith.constant 0 : index
    %c0_19 = arith.constant 0 : index
    %40 = vector.load %arg10[%c4, %c0_18, %c0_19] : memref<6x16x16xbf16, #tpu.memory_space<vmem>>, vector<1x16x16xbf16>
    %41 = vector.shape_cast %40 : vector<1x16x16xbf16> to vector<16x16xbf16>
    %cst_20 = arith.constant dense<0.000000e+00> : vector<16x128xf32>
    %42 = tpu.matmul %41, %39, %cst_20 {dimension_numbers = #tpu.dot_dimension_numbers<[1], [0], [0], [1], [0, 0, 1, 1], [], []>} : vector<16x16xbf16>, vector<16x128xbf16>, vector<16x128xf32> -> vector<16x128xf32>
    %43 = arith.addf %37, %42 : vector<16x128xf32>
    %44 = vector.extract_strided_slice %12 {offsets = [0, 768], sizes = [16, 128], strides = [1, 1]} : vector<16x896xf32> to vector<16x128xf32>
    %45 = arith.truncf %44 : vector<16x128xf32> to vector<16x128xbf16>
    %c5 = arith.constant 5 : index
    %c0_21 = arith.constant 0 : index
    %c0_22 = arith.constant 0 : index
    %46 = vector.load %arg10[%c5, %c0_21, %c0_22] : memref<6x16x16xbf16, #tpu.memory_space<vmem>>, vector<1x16x16xbf16>
    %47 = vector.shape_cast %46 : vector<1x16x16xbf16> to vector<16x16xbf16>
    %cst_23 = arith.constant dense<0.000000e+00> : vector<16x128xf32>
    %48 = tpu.matmul %47, %45, %cst_23 {dimension_numbers = #tpu.dot_dimension_numbers<[1], [0], [0], [1], [0, 0, 1, 1], [], []>} : vector<16x16xbf16>, vector<16x128xbf16>, vector<16x128xf32> -> vector<16x128xf32>
    %49 = arith.addf %43, %48 : vector<16x128xf32>
    %c0_24 = arith.constant 0 : index
    %c0_25 = arith.constant 0 : index
    %c0_26 = arith.constant 0 : index
    %50 = vector.load %arg5[%c0_24, %c0_25, %c0_26] : memref<1x1x128xf32, #tpu.memory_space<vmem>>, vector<1x1x128xf32>
    %51 = vector.shape_cast %50 : vector<1x1x128xf32> to vector<1x128xf32>
    %c0_27 = arith.constant 0 : index
    %c0_28 = arith.constant 0 : index
    %c0_29 = arith.constant 0 : index
    %52 = vector.load %arg6[%c0_27, %c0_28, %c0_29] : memref<1x1x128xf32, #tpu.memory_space<vmem>>, vector<1x1x128xf32>
    %53 = vector.shape_cast %52 : vector<1x1x128xf32> to vector<1x128xf32>
    %cst_30 = arith.constant dense<0.000000e+00> : vector<16xf32>
    %54 = vector.multi_reduction <add>, %49, %cst_30 [1] : vector<16x128xf32> to vector<16xf32>
    %55 = vector.shape_cast %54 : vector<16xf32> to vector<16x1xf32>
    %cst_31 = arith.constant 3.125000e-02 : f32
    %56 = vector.broadcast %cst_31 : f32 to vector<16x1xf32>
    %57 = arith.mulf %55, %56 : vector<16x1xf32>
    %58 = vector.broadcast %57 : vector<16x1xf32> to vector<16x128xf32>
    %59 = arith.subf %49, %58 : vector<16x128xf32>
    %60 = vector.broadcast %7 : vector<1x128xf32> to vector<16x128xf32>
    %61 = arith.mulf %59, %60 : vector<16x128xf32>
    %62 = arith.mulf %61, %61 : vector<16x128xf32>
    %cst_32 = arith.constant dense<0.000000e+00> : vector<16xf32>
    %63 = vector.multi_reduction <add>, %62, %cst_32 [1] : vector<16x128xf32> to vector<16xf32>
    %64 = vector.shape_cast %63 : vector<16xf32> to vector<16x1xf32>
    %cst_33 = arith.constant 3.125000e-02 : f32
    %65 = vector.broadcast %cst_33 : f32 to vector<16x1xf32>
    %66 = arith.mulf %64, %65 : vector<16x1xf32>
    %cst_34 = arith.constant 9.99999974E-6 : f32
    %67 = vector.broadcast %cst_34 : f32 to vector<16x1xf32>
    %68 = arith.addf %66, %67 : vector<16x1xf32>
    %69 = math.rsqrt %68 : vector<16x1xf32>
    %70 = vector.broadcast %69 : vector<16x1xf32> to vector<16x128xf32>
    %71 = arith.mulf %61, %70 : vector<16x128xf32>
    %72 = vector.broadcast %51 : vector<1x128xf32> to vector<16x128xf32>
    %73 = arith.mulf %71, %72 : vector<16x128xf32>
    %74 = vector.broadcast %53 : vector<1x128xf32> to vector<16x128xf32>
    %75 = arith.addf %73, %74 : vector<16x128xf32>
    %cst_35 = arith.constant 0.000000e+00 : f32
    %76 = vector.broadcast %cst_35 : f32 to vector<16x128xf32>
    %77 = arith.maximumf %75, %76 : vector<16x128xf32>
    %78 = arith.truncf %77 : vector<16x128xf32> to vector<16x128xbf16>
    %c0_36 = arith.constant 0 : index
    %c0_37 = arith.constant 0 : index
    %c0_38 = arith.constant 0 : index
    %79 = vector.load %arg4[%c0_36, %c0_37, %c0_38] : memref<1x128x128xbf16, #tpu.memory_space<vmem>>, vector<1x128x128xbf16>
    %80 = vector.shape_cast %79 : vector<1x128x128xbf16> to vector<128x128xbf16>
    %cst_39 = arith.constant dense<0.000000e+00> : vector<16x128xf32>
    %81 = tpu.matmul %78, %80, %cst_39 {dimension_numbers = #tpu.dot_dimension_numbers<[1], [0], [0], [1], [0, 0, 1, 1], [], []>} : vector<16x128xbf16>, vector<128x128xbf16>, vector<16x128xf32> -> vector<16x128xf32>
    %c0_40 = arith.constant 0 : index
    %c0_41 = arith.constant 0 : index
    %c0_42 = arith.constant 0 : index
    %82 = vector.load %arg7[%c0_40, %c0_41, %c0_42] : memref<1x1x128xf32, #tpu.memory_space<vmem>>, vector<1x1x128xf32>
    %83 = vector.shape_cast %82 : vector<1x1x128xf32> to vector<1x128xf32>
    %c0_43 = arith.constant 0 : index
    %c0_44 = arith.constant 0 : index
    %c0_45 = arith.constant 0 : index
    %84 = vector.load %arg8[%c0_43, %c0_44, %c0_45] : memref<1x1x128xf32, #tpu.memory_space<vmem>>, vector<1x1x128xf32>
    %85 = vector.shape_cast %84 : vector<1x1x128xf32> to vector<1x128xf32>
    %cst_46 = arith.constant dense<0.000000e+00> : vector<16xf32>
    %86 = vector.multi_reduction <add>, %81, %cst_46 [1] : vector<16x128xf32> to vector<16xf32>
    %87 = vector.shape_cast %86 : vector<16xf32> to vector<16x1xf32>
    %cst_47 = arith.constant 3.125000e-02 : f32
    %88 = vector.broadcast %cst_47 : f32 to vector<16x1xf32>
    %89 = arith.mulf %87, %88 : vector<16x1xf32>
    %90 = vector.broadcast %89 : vector<16x1xf32> to vector<16x128xf32>
    %91 = arith.subf %81, %90 : vector<16x128xf32>
    %92 = vector.broadcast %7 : vector<1x128xf32> to vector<16x128xf32>
    %93 = arith.mulf %91, %92 : vector<16x128xf32>
    %94 = arith.mulf %93, %93 : vector<16x128xf32>
    %cst_48 = arith.constant dense<0.000000e+00> : vector<16xf32>
    %95 = vector.multi_reduction <add>, %94, %cst_48 [1] : vector<16x128xf32> to vector<16xf32>
    %96 = vector.shape_cast %95 : vector<16xf32> to vector<16x1xf32>
    %cst_49 = arith.constant 3.125000e-02 : f32
    %97 = vector.broadcast %cst_49 : f32 to vector<16x1xf32>
    %98 = arith.mulf %96, %97 : vector<16x1xf32>
    %cst_50 = arith.constant 9.99999974E-6 : f32
    %99 = vector.broadcast %cst_50 : f32 to vector<16x1xf32>
    %100 = arith.addf %98, %99 : vector<16x1xf32>
    %101 = math.rsqrt %100 : vector<16x1xf32>
    %102 = vector.broadcast %101 : vector<16x1xf32> to vector<16x128xf32>
    %103 = arith.mulf %93, %102 : vector<16x128xf32>
    %104 = vector.broadcast %83 : vector<1x128xf32> to vector<16x128xf32>
    %105 = arith.mulf %103, %104 : vector<16x128xf32>
    %106 = vector.broadcast %85 : vector<1x128xf32> to vector<16x128xf32>
    %107 = arith.addf %105, %106 : vector<16x128xf32>
    %108 = arith.addf %107, %8 : vector<16x128xf32>
    %cst_51 = arith.constant 0.000000e+00 : f32
    %109 = vector.broadcast %cst_51 : f32 to vector<16x128xf32>
    %110 = arith.maximumf %108, %109 : vector<16x128xf32>
    %c0_52 = arith.constant 0 : index
    %c0_53 = arith.constant 0 : index
    %111 = vector.load %arg9[%c0_52, %c0_53] : memref<16x128xf32, #tpu.memory_space<vmem>>, vector<16x128xf32>
    tpu.vector_store %arg9[%c0_52, %c0_53], %110 {strides = array<i32>} : memref<16x128xf32, #tpu.memory_space<vmem>>, vector<16x128xf32>,
    return
  }
  func.func @transform_0(%arg0: i32) -> (i32, i32) {
    %c0_i32 = arith.constant 0 : i32
    %c0_i32_0 = arith.constant 0 : i32
    %c0_i32_1 = arith.constant 0 : i32
    return %c0_i32, %c0_i32_0 : i32, i32
  }
  func.func @transform_2(%arg0: i32) -> (i32, i32, i32) {
    %c0_i32 = arith.constant 0 : i32
    %c0_i32_0 = arith.constant 0 : i32
    %c0_i32_1 = arith.constant 0 : i32
    return %arg0, %c0_i32, %c0_i32_0 : i32, i32, i32
  }
  func.func @transform_3(%arg0: i32) -> (i32, i32, i32) {
    %c0_i32 = arith.constant 0 : i32
    %c0_i32_0 = arith.constant 0 : i32
    %c0_i32_1 = arith.constant 0 : i32
    return %arg0, %c0_i32, %c0_i32_0 : i32, i32, i32
  }
  func.func @transform_4(%arg0: i32) -> (i32, i32, i32) {
    %c0_i32 = arith.constant 0 : i32
    %c0_i32_0 = arith.constant 0 : i32
    %c0_i32_1 = arith.constant 0 : i32
    return %arg0, %c0_i32, %c0_i32_0 : i32, i32, i32
  }
  func.func @transform_5(%arg0: i32) -> (i32, i32, i32) {
    %c0_i32 = arith.constant 0 : i32
    %c0_i32_0 = arith.constant 0 : i32
    %c0_i32_1 = arith.constant 0 : i32
    return %arg0, %c0_i32, %c0_i32_0 : i32, i32, i32
  }
  func.func @transform_6(%arg0: i32) -> (i32, i32, i32) {
    %c0_i32 = arith.constant 0 : i32
    %c0_i32_0 = arith.constant 0 : i32
    %c0_i32_1 = arith.constant 0 : i32
    return %arg0, %c0_i32, %c0_i32_0 : i32, i32, i32
  }
  func.func @transform_7(%arg0: i32) -> (i32, i32, i32) {
    %c0_i32 = arith.constant 0 : i32
    %c0_i32_0 = arith.constant 0 : i32
    %c0_i32_1 = arith.constant 0 : i32
    return %arg0, %c0_i32, %c0_i32_0 : i32, i32, i32
  }
  func.func @transform_8(%arg0: i32) -> (i32, i32) {
    %c0_i32 = arith.constant 0 : i32
    %c0_i32_0 = arith.constant 0 : i32
    %c0_i32_1 = arith.constant 0 : i32
    return %c0_i32, %c0_i32_0 : i32, i32
  }
}

</mosaic_0001>

<bundles_post_ra>
// kernel: tpu_custom_call.1
= control target key start
LH: loop header
LB: loop body
LE: loop exit
PB: predicated region body
PF: predicated region fallthrough
CT: control target
= control target key end

     0   :  { %s2673_s0 = inlined_call_operand.hbm [shape: f32[16,128], index: 0, kind: input, shape index: {}]   ;;  %s2674_s1 = inlined_call_operand.hbm [shape: bf16[6,16,16], index: 1, kind: input, shape index: {}]   ;;  %s2675_s2 = inlined_call_operand.hbm [shape: bf16[4,128,896], index: 2, kind: input, shape index: {}]   ;;  %s2676_s3 = inlined_call_operand.hbm [shape: bf16[4,128,128], index: 3, kind: input, shape index: {}]   ;;  %s2677_s4 = inlined_call_operand.hbm [shape: f32[4,1,128], index: 4, kind: input, shape index: {}]   ;;  %s2678_s5 = inlined_call_operand.vmem [shape: f32[4,1,128], index: 5, kind: input, shape index: {}]   ;;  %s2679_s6 = inlined_call_operand.hbm [shape: f32[4,1,128], index: 6, kind: input, shape index: {}]   ;;  %s2680_s7 = inlined_call_operand.hbm [shape: f32[4,1,128], index: 7, kind: input, shape index: {}]   ;;  %s2681_s8 = inlined_call_operand.hbm [shape: f32[16,128], index: 8, kind: output, shape index: {}]  }
   0x1   :  { %2686 = sst [smem:[#allocation29_spill]] %s2673_s0 }
   0x2   :  { %2687 = sst [smem:[#allocation30_spill]] %s2675_s2 }
   0x3   :  { %2688 = sst [smem:[#allocation31_spill]] %s2677_s4 }
   0x4   :  { %2689 = sst [smem:[#allocation32_spill]] %s2681_s8 }
   0x5   :  { %13 = vsyncpa [#allocation5], 0 }
   0x6   :  { %14 = vsyncpa [#allocation8], 0 }
   0x7   :  { %16 = vsyncpa [#allocation8 + $0x1], 0 }
   0x8   :  { %17 = vsyncpa [#allocation11], 0 }
   0x9   :  { %19 = vsyncpa [#allocation11 + $0x1], 0 }
   0xa   :  { %20 = vsyncpa [#allocation14], 0 }
   0xb   :  { %22 = vsyncpa [#allocation14 + $0x1], 0 }
   0xc   :  { %23 = vsyncpa [#allocation6], 0  ;;  %s2290_s27 = smov 0   ;;  %s2292_s28 = smov 0  }
   0xd   :  { %s2294_s29 = smov 0   ;;  %s2296_s30 = smov 0  }
   0xe LB: > { %2690 = sst [smem:[#allocation26_spill]] %s2227_s29  ;;  %s2311_s9 = sadd.s32 1, %s2231_s30   ;;  %s2231_s30 = sphi %s2296_s30, %s2702_s30   ;;  %s2227_s29 = sphi %s2294_s29, %s2704_s29   ;;  %s2223_s28 = sphi %s2292_s28, %s2706_s28   ;;  %s2219_s27 = sphi %s2290_s27, %s2705_s27  }
   0xf   : > { %2691 = sst [smem:[#allocation27_spill]] %s2311_s9  ;;  %s57_s10 = sadd.s32 1, %s2227_s29 }
  0x10   : > { %s54_s11 = ssub.s32 %s2231_s30, %s2311_s9  ;;  %p64_p0 = scmp.ne.s32.totalorder %s2227_s29, %s2223_s28 }
  0x11   : > { %p55_p1 = scmp.eq.s32.totalorder %s54_s11, 0  ;;  %p65_p2 = scmp.eq.s32.totalorder %s2231_s30, 0 }
  0x12   : > { %p1887_p3 = scmp.lt.s32.totalorder %s2231_s30, 4  ;;  %s2682_s13 = sand.u32 1, %s2231_s30  }
  0x13   : > { %s2321_s12 = scalar_select %p55_p1, %s2227_s29, %s57_s10  }
  0x14   : > { %p66_p4 = por %p65_p2, %p64_p0  ;;  %s2325_s14 = sand.u32 1, %s2227_s29  }
  0x15   : > { %2692 = sst [smem:[#allocation28_spill]] %s2321_s12  ;;  %s1845_s15 = smul.u32 448, %s2325_s14 }
  0x16   : > { %p2328_p5 = pnand %p1887_p3, %p66_p4  ;;  %s1846_s17 = smul.u32 448, %s2231_s30 }
  0x17   : > { %s2694_s2 = sld [smem:[#allocation30_spill]]  ;;  %s263_s21 = scalar_lea.vmem [#allocation7], %s1845_s15 }
  0x18   : > { %s271_s22 = sshll.u32 %s263_s21, 4  ;;  %s2338_s24 = scalar_lea.sflag [#allocation8], %s2682_s13  ;;  %s272_s22 = int_to_ptr.vmem [resolvable:$true] %s271_s22 }
  0x19   : > { %p2342_p7 = pneg %p2328_p5 }
  0x1d   : > { %s268_s20 = scalar_lea.hbm %s2694_s2, %s1846_s17  ;;  %s1954_s17 = scalar_lea.hbm %s2694_s2, 1792 }
  0x1e   : > { %s269_s23 = sshll.u32 %s268_s20, 4  ;;  %s270_s23 = int_to_ptr.hbm [resolvable:$true] %s269_s23 }
  0x1f   : > { %s1947_s25 = sshra.s32 %s270_s23, 4  ;;  %s1948_s25 = int_to_ptr.hbm [resolvable:$true] %s1947_s25 }
  0x20   : > { %s1949_s26 = scalar_lea.hbm %s1948_s25, 448  ;;  %p1955_p10 = scmp.lt.s32.totalorder %s1948_s25, %s2694_s2 }
  0x21   : > { %p1950_p6 = scmp.ne.s32.totalorder %s1948_s25, %s1949_s26  ;;  %p1956_p11 = scmp.lt.s32.totalorder %s1954_s17, %s1949_s26 }
  0x23   : > { %p1952_p8 = pnand %p2342_p7, %p1950_p6  ;;  %p1957_p12 = por %p1956_p11, %p1955_p10 }
  0x25   : > { %p1953_p9 = pneg %p1952_p8 }
  0x27   : > { %p1958_p13 = pnand %p1957_p12, %p1953_p9 }
  0x29   : > { %1961 = shalt.err (!%p1958_p13)
}
  0x2a   : > { %s2233_s20 = smov 448   ;;  %s2234_s21 = smov 28  }
  0x2b   : > { %1873 = dma.hbm_to_vmem [thread:$0]  (!%p2328_p5), %s270_s23, 7168, %s272_s22, %s2338_s24, %s2233_s20, %s2233_s20, %s2234_s21  }
  0x2c   : > { %s2696_s4 = sld [smem:[#allocation31_spill]]  ;;  %s306_s18 = scalar_lea.vmem [#allocation10], %s2325_s14 }
  0x2d   : > { %s313_s25 = sshll.u32 %s306_s18, 4  ;;  %s2697_s17 = sand.u32 1, %s2231_s30   ;;  %s314_s25 = int_to_ptr.vmem [resolvable:$true] %s313_s25 }
  0x2e   : > { %s2364_s19 = scalar_lea.sflag [#allocation11], %s2697_s17 }
  0x32   : > { %s309_s13 = scalar_lea.hbm %s2696_s4, %s2231_s30  ;;  %s1984_s20 = scalar_lea.hbm %s2696_s4, 4 }
  0x33   : > { %s311_s26 = sshll.u32 %s309_s13, 4  ;;  %s312_s26 = int_to_ptr.hbm [resolvable:$true] %s311_s26 }
  0x34   : > { %s1977_s2 = sshra.s32 %s312_s26, 4  ;;  %s1978_s2 = int_to_ptr.hbm [resolvable:$true] %s1977_s2 }
  0x35   : > { %s1979_s12 = scalar_lea.hbm %s1978_s2, 1  ;;  %p1985_p3 = scmp.lt.s32.totalorder %s1978_s2, %s2696_s4 }
  0x36   : > { %p1980_p0 = scmp.ne.s32.totalorder %s1978_s2, %s1979_s12  ;;  %p1986_p4 = scmp.lt.s32.totalorder %s1984_s20, %s1979_s12 }
  0x38   : > { %p1982_p1 = pnand %p1980_p0, %p2342_p7  ;;  %p1987_p6 = por %p1986_p4, %p1985_p3 }
  0x3a   : > { %p1983_p2 = pneg %p1982_p1 }
  0x3c   : > { %p1988_p8 = pnand %p1987_p6, %p1983_p2 }
  0x3e   : > { %1991 = shalt.err (!%p1988_p8)
}
  0x3f   : > { %1879 = dma.hbm_to_vmem [thread:$0]  (!%p2328_p5), %s312_s26, 16, %s314_s25, %s2364_s19  }
  0x40   : > { %s2378_s13 = sadd.s32 4294967295, %s2231_s30   ;;  %p70_p9 = scmp.ne.s32.totalorder %s2223_s28, %s2219_s27 }
  0x41   : > { %p71_p10 = scmp.eq.s32.totalorder %s2378_s13, 0  ;;  %p1471_p11 = scmp.ge.s32.totalorder %s2231_s30, 1 }
  0x42   : > { %p232_p12 = scmp.lt.s32.totalorder %s2231_s30, 5  ;;  %p1472_p0 = scmp.ne.s32.totalorder %s2378_s13, 0 }
  0x43   : > { %p2387_p13 = por %p71_p10, %p70_p9  ;;  %s2700_s0 = sld [smem:[#allocation29_spill]] }
  0x44   : > { %p2392_p1 = pnand %p1471_p11, %p232_p12  ;;  %s2235_s27 = smov [#allocation4]  }
  0x45   : > { %s245_s26 = sshll.u32 %s2235_s27, 4  ;;  %s1475_s17 = sshll.u32 %s2325_s14, 6  ;;  %s246_s26 = int_to_ptr.vmem [resolvable:$true] %s245_s26 }
  0x46   : > { %p1866_p2 = pneg %p2392_p1  ;;  %s1774_s22 = sshll.u32 %s2231_s30, 6 }
  0x47   : > { %s2236_s23 = smov 128   ;;  %s2237_s20 = smov 8  }
  0x48   : > { %p1867_p3 = pnand %p1866_p2, %p71_p10  ;;  %s290_s15 = scalar_lea.hbm %s2676_s3, %s1774_s22 }
  0x49   : > { %s243_s25 = sshll.u32 %s2700_s0, 4  ;;  %s285_s18 = scalar_lea.vmem [#allocation9], %s1475_s17  ;;  %s244_s25 = int_to_ptr.hbm [resolvable:$true] %s243_s25 }
  0x4a   : > { %1869 = dma.hbm_to_vmem [thread:$0]  (!%p1867_p3), %s244_s25, 256, %s246_s26, [#allocation5], %s2236_s23, %s2236_s23, %s2237_s20  }
  0x4b   : > { %s293_s0 = sshll.u32 %s285_s18, 4  ;;  %s291_s4 = sshll.u32 %s290_s15, 4  ;;  %s294_s0 = int_to_ptr.vmem [resolvable:$true] %s293_s0  ;;  %s292_s4 = int_to_ptr.hbm [resolvable:$true] %s291_s4 }
  0x4c   : > { %s2037_s29 = sshra.s32 %s292_s4, 4  ;;  %s2044_s25 = scalar_lea.hbm %s2676_s3, 256  ;;  %s2038_s29 = int_to_ptr.hbm [resolvable:$true] %s2037_s29 }
  0x4d   : > { %s2039_s27 = scalar_lea.hbm %s2038_s29, 64  ;;  %p2045_p9 = scmp.lt.s32.totalorder %s2038_s29, %s2676_s3 }
  0x4e   : > { %p2040_p4 = scmp.ne.s32.totalorder %s2038_s29, %s2039_s27  ;;  %p2046_p11 = scmp.lt.s32.totalorder %s2044_s25, %s2039_s27 }
  0x50   : > { %p2042_p6 = pnand %p2040_p4, %p2342_p7  ;;  %p2047_p12 = por %p2046_p11, %p2045_p9 }
  0x52   : > { %p2043_p8 = pneg %p2042_p6 }
  0x54   : > { %p2048_p2 = pnand %p2047_p12, %p2043_p8 }
  0x56   : > { %2051 = shalt.err (!%p2048_p2)
}
  0x57   : > { %s2238_s17 = smov 64   ;;  %s2239_s22 = smov 4  }
  0x58   : > { %1876 = dma.hbm_to_vmem [thread:$0]  (!%p2328_p5), %s292_s4, 1024, %s294_s0, %s2338_s24, %s2238_s17, %s2238_s17, %s2239_s22  }
  0x59   : > { %s332_s9 = scalar_lea.hbm %s2679_s6, %s2231_s30  ;;  %s329_s21 = scalar_lea.vmem [#allocation12], %s2325_s14 }
  0x5a   : > { %s336_s11 = sshll.u32 %s329_s21, 4  ;;  %s334_s29 = sshll.u32 %s332_s9, 4  ;;  %s337_s11 = int_to_ptr.vmem [resolvable:$true] %s336_s11  ;;  %s335_s29 = int_to_ptr.hbm [resolvable:$true] %s334_s29 }
  0x5b   : > { %s2067_s15 = sshra.s32 %s335_s29, 4  ;;  %s2074_s0 = scalar_lea.hbm %s2679_s6, 4  ;;  %s2068_s15 = int_to_ptr.hbm [resolvable:$true] %s2067_s15 }
  0x5c   : > { %s2069_s18 = scalar_lea.hbm %s2068_s15, 1  ;;  %p2075_p8 = scmp.lt.s32.totalorder %s2068_s15, %s2679_s6 }
  0x5d   : > { %p2070_p3 = scmp.ne.s32.totalorder %s2068_s15, %s2069_s18  ;;  %p2076_p9 = scmp.lt.s32.totalorder %s2074_s0, %s2069_s18 }
  0x5f   : > { %p2072_p4 = pnand %p2070_p3, %p2342_p7  ;;  %p2077_p11 = por %p2076_p9, %p2075_p8 }
  0x61   : > { %p2073_p6 = pneg %p2072_p4 }
  0x63   : > { %p2078_p12 = pnand %p2077_p11, %p2073_p6 }
  0x65   : > { %2081 = shalt.err (!%p2078_p12)
}
  0x66   : > { %1882 = dma.hbm_to_vmem [thread:$0]  (!%p2328_p5), %s335_s29, 16, %s337_s11, %s2364_s19  }
  0x67   : > { %s349_s17 = scalar_lea.hbm %s2680_s7, %s2231_s30  ;;  %s346_s20 = scalar_lea.vmem [#allocation13], %s2325_s14 }
  0x68   : > { %s351_s22 = sshll.u32 %s349_s17, 4  ;;  %s353_s8 = sshll.u32 %s346_s20, 4  ;;  %s352_s22 = int_to_ptr.hbm [resolvable:$true] %s351_s22  ;;  %s354_s8 = int_to_ptr.vmem [resolvable:$true] %s353_s8 }
  0x69   : > { %s344_s9 = scalar_lea.sflag [#allocation14], %s2325_s14  ;;  %s2097_s21 = sshra.s32 %s352_s22, 4  ;;  %s2098_s21 = int_to_ptr.hbm [resolvable:$true] %s2097_s21 }
  0x6a   : > { %s2099_s15 = scalar_lea.hbm %s2098_s21, 1  ;;  %s2104_s19 = scalar_lea.hbm %s2680_s7, 4 }
  0x6b   : > { %p2100_p2 = scmp.ne.s32.totalorder %s2098_s21, %s2099_s15  ;;  %p2105_p6 = scmp.lt.s32.totalorder %s2098_s21, %s2680_s7 }
  0x6c   : > { %p2106_p8 = scmp.lt.s32.totalorder %s2104_s19, %s2099_s15 }
  0x6d   : > { %p2102_p3 = pnand %p2100_p2, %p2342_p7 }
  0x6e   : > { %p2107_p9 = por %p2106_p8, %p2105_p6 }
  0x6f   : > { %p2103_p4 = pneg %p2102_p3 }
  0x71   : > { %p2108_p11 = pnand %p2107_p9, %p2103_p4 }
  0x73   : > { %2111 = shalt.err (!%p2108_p11)
}
  0x74   : > { %1885 = dma.hbm_to_vmem [thread:$0]  (!%p2328_p5), %s352_s22, 16, %s354_s8, %s344_s9  }
  0x75   : > { %362 = sbr.rel (%p2392_p1) target bundleno = 1180 (0x49c), region = 48 }
  0x7a   : > { %2196 = dma.done.wait (%p71_p10), [#allocation5], 256  }
  0x7b   : > { %2198 = vsyncadd (%p71_p10), [#allocation5], 4294967040  ;;  %s369_s30 = sand.u32 1, %s2378_s13   ;;  %s2459_s14 = sand.u32 1, %s2223_s28  }
  0x7c   : > { %s1847_s10 = smul.u32 448, %s2459_s14  ;;  %s370_s25 = scalar_lea.sflag [#allocation8], %s369_s30 }
  0x7e   : > { %s2462_s16 = scalar_lea.vmem [#allocation7], %s1847_s10 }
  0x7f   : > { %2200 = dma.done.wait (%p2387_p13), %s370_s25, 8192  }
  0x80   : > { %2202 = vsyncadd (%p2387_p13), %s370_s25, 4294959104  ;;  %s1480_s12 = sshll.u32 %s2459_s14, 6  ;;  %s390_s4 = scalar_lea.sflag [#allocation11], %s369_s30 }
  0x81   : > { %s2469_s0 = scalar_lea.vmem [#allocation9], %s1480_s12  ;;  %s392_s24 = scalar_lea.vmem [#allocation10], %s2459_s14 }
  0x82   : > { %2204 = dma.done.wait (%p2387_p13), %s390_s4, 32  }
  0x83   : > { %2206 = vsyncadd (%p2387_p13), %s390_s4, 4294967264  ;;  %s401_s26 = scalar_lea.vmem [#allocation12], %s2459_s14  ;;  %s408_s23 = scalar_lea.sflag [#allocation14], %s2459_s14 }
  0x84   : > { %s410_s17 = scalar_lea.vmem [#allocation13], %s2459_s14 }
  0x85   : > { %2208 = dma.done.wait (%p2387_p13), %s408_s23, 16  }
  0x86   : > { %2210 = vsyncadd (%p2387_p13), %s408_s23, 4294967280  ;;  %p457_p5 = scmp.lt.s32.totalorder %s2378_s13, 3  ;;  %464 = sbr.rel (%p1472_p0) target bundleno = 144 (0x90), region = 76 }
  0x87   : > { %s476_s2 = sshll.u32 (!%p1472_p0), %s2674_s1, 4  ;;  %s2240_s18 = smov (!%p1472_p0), [#allocation2]   ;;  %s477_s2 = int_to_ptr.hbm [resolvable:$true] %s476_s2 }
  0x88   : > { %s2485_s22 = scalar_select %p457_p5, %s2378_s13, 3 }
  0x89   : > { %s478_s27 = sshll.u32 (!%p1472_p0), %s2240_s18, 4  ;;  %s479_s27 = int_to_ptr.vmem [resolvable:$true] %s478_s27 }
  0x8a   : > { %s459_s9 = scalar_lea.vmem %s2678_s5, %s2485_s22 }
  0x8b   : > { %v465_v0 = vld [vmem:[#allocation4] sm:$0xff]  ;;  %v466_v1 = vld [vmem:[#allocation4 + $0x8] sm:$0xff]  ;;  %481 = dma.hbm_to_vmem [thread:$0]  %s477_s2, 768, %s479_s27, [#allocation3] }
  0x8c   : > { %467 = vst [vmem:[#allocation15] sm:$0xff] %v465_v0 }
  0x8d   : > { %468 = vst [vmem:[#allocation15 + $0x8] sm:$0xff] %v466_v1 }
  0x8e   : > { %2211 = dma.done.wait [#allocation3], 768 }
  0x8f   : > { %2212 = vsyncadd [#allocation3], 4294966528 }
  0x90 PF: > { %v1681_v2 = vld [vmem:[%s2462_s16 + $0x188] sm:$0xf]  ;;  %v1827_v3 = vld [vmem:[%s2462_s16 + $0x1a0] sm:$0xf0]  ;;  %v1824_v4 = vld [vmem:[%s2462_s16 + $0x18c] sm:$0xf] }
  0x91   : > { %v1682_v5 = vor.u32 %v1827_v3, %v1681_v2  ;;  %v1683_v6 = vld [vmem:[%s2462_s16 + $0x1a4] sm:$0xf0]  ;;  %v1689_v7 = vld [vmem:[%s2462_s16 + $0x190] sm:$0xf]  ;;  %v1828_v8 = vld [vmem:[%s2462_s16 + $0x1a8] sm:$0xf0] }
  0x92   : > { %v1686_v9 = vor.u32 %v1824_v4, %v1683_v6  ;;  %v1690_v10 = vor.u32 %v1828_v8, %v1689_v7  ;;  %v1653_v11 = vld [vmem:[%s2462_s16 + $0x150] sm:$0xf]  ;;  %v1820_v12 = vld [vmem:[%s2462_s16 + $0x168] sm:$0xf0]  ;;  %v1817_v13 = vld [vmem:[%s2462_s16 + $0x154] sm:$0xf] }
  0x93   : > { %847 = vmatpush.bf16.msra.mxu0 %v1682_v5  ;;  %v1654_v14 = vor.u32 %v1820_v12, %v1653_v11  ;;  %v1655_v15 = vld [vmem:[%s2462_s16 + $0x16c] sm:$0xf0]  ;;  %v1661_v16 = vld [vmem:[%s2462_s16 + $0x158] sm:$0xf]  ;;  %v1821_v17 = vld [vmem:[%s2462_s16 + $0x170] sm:$0xf0] }
  0x94   : > { %861 = vmatpush.bf16.msra.mxu1 %v1686_v9  ;;  %875 = vmatpush.bf16.msra.mxu2 %v1690_v10  ;;  %v1658_v18 = vor.u32 %v1817_v13, %v1655_v15  ;;  %v1662_v19 = vor.u32 %v1821_v17, %v1661_v16  ;;  %v1825_v20 = vld [vmem:[%s2462_s16 + $0x194] sm:$0xf]  ;;  %v1691_v21 = vld [vmem:[%s2462_s16 + $0x1ac] sm:$0xf0]  ;;  %v1625_v22 = vld [vmem:[%s2462_s16 + $0x118] sm:$0xf] }
  0x95   : > { %v1694_v23 = vor.u32 %v1825_v20, %v1691_v21  ;;  %v1813_v24 = vld [vmem:[%s2462_s16 + $0x130] sm:$0xf0]  ;;  %v1810_v25 = vld [vmem:[%s2462_s16 + $0x11c] sm:$0xf]  ;;  %v1627_v26 = vld [vmem:[%s2462_s16 + $0x134] sm:$0xf0] }
  0x96   : > { %v1633_v27 = vld [vmem:[%s2462_s16 + $0x120] sm:$0xf]  ;;  %v1814_v28 = vld [vmem:[%s2462_s16 + $0x138] sm:$0xf0]  ;;  %v1626_v30 = vor.u32 %v1813_v24, %v1625_v22  ;;  %v1663_v31 = vld [vmem:[%s2462_s16 + $0x174] sm:$0xf0]  ;;  %v1630_v34 = vor.u32 %v1810_v25, %v1627_v26 }
  0x97   : > { %v1818_v29 = vld [vmem:[%s2462_s16 + $0x15c] sm:$0xf]  ;;  %848 = vmatpush.bf16.msra.mxu0 %v1654_v14  ;;  %889 = vmatpush.bf16.msra.mxu3 %v1694_v23  ;;  %v1597_v32 = vld [vmem:[%s2462_s16 + $0xe0] sm:$0xf]  ;;  %v1634_v35 = vor.u32 %v1814_v28, %v1633_v27  ;;  %v1803_v37 = vld [vmem:[%s2462_s16 + $0xe4] sm:$0xf] }
  0x98   : > { %v1806_v33 = vld [vmem:[%s2462_s16 + $0xf8] sm:$0xf0]  ;;  %862 = vmatpush.bf16.msra.mxu1 %v1658_v18  ;;  %876 = vmatpush.bf16.msra.mxu2 %v1662_v19  ;;  %v1666_v36 = vor.u32 %v1818_v29, %v1663_v31  ;;  %v1599_v38 = vld [vmem:[%s2462_s16 + $0xfc] sm:$0xf0]  ;;  %v1605_v39 = vld [vmem:[%s2462_s16 + $0xe8] sm:$0xf] }
  0x99   : > { %v1807_v40 = vld [vmem:[%s2462_s16 + $0x100] sm:$0xf0]  ;;  %v1635_v42 = vld [vmem:[%s2462_s16 + $0x13c] sm:$0xf0]  ;;  %v1598_v43 = vor.u32 %v1806_v33, %v1597_v32  ;;  %v1569_v45 = vld [vmem:[%s2462_s16 + $0xa8] sm:$0xf]  ;;  %v1602_v47 = vor.u32 %v1803_v37, %v1599_v38 }
  0x9a   : > { %v1811_v41 = vld [vmem:[%s2462_s16 + $0x124] sm:$0xf]  ;;  %v1606_v48 = vor.u32 %v1807_v40, %v1605_v39  ;;  %v1796_v49 = vld [vmem:[%s2462_s16 + $0xac] sm:$0xf]  ;;  %v1607_v51 = vld [vmem:[%s2462_s16 + $0x104] sm:$0xf0] }
  0x9b   : > { %849 = vmatpush.bf16.msra.mxu0 %v1626_v30  ;;  %890 = vmatpush.bf16.msra.mxu3 %v1666_v36  ;;  %v1638_v44 = vor.u32 %v1811_v41, %v1635_v42  ;;  %v1799_v46 = vld [vmem:[%s2462_s16 + $0xc0] sm:$0xf0]  ;;  %v1804_v50 = vld [vmem:[%s2462_s16 + $0xec] sm:$0xf]  ;;  %v1571_v52 = vld [vmem:[%s2462_s16 + $0xc4] sm:$0xf0] }
  0x9c   : > { %863 = vmatpush.bf16.msra.mxu1 %v1630_v34  ;;  %877 = vmatpush.bf16.msra.mxu2 %v1634_v35  ;;  %v1577_v53 = vld [vmem:[%s2462_s16 + $0xb0] sm:$0xf]  ;;  %v1800_v54 = vld [vmem:[%s2462_s16 + $0xc8] sm:$0xf0]  ;;  %v1570_v55 = vor.u32 %v1799_v46, %v1569_v45  ;;  %v1610_v56 = vor.u32 %v1804_v50, %v1607_v51  ;;  %v1574_v59 = vor.u32 %v1796_v49, %v1571_v52  ;;  %v1789_v61 = vld [vmem:[%s2462_s16 + $0x74] sm:$0xf] }
  0x9d   : > { %v1541_v57 = vld [vmem:[%s2462_s16 + $0x70] sm:$0xf]  ;;  %v1792_v58 = vld [vmem:[%s2462_s16 + $0x88] sm:$0xf0]  ;;  %v1578_v60 = vor.u32 %v1800_v54, %v1577_v53  ;;  %v1797_v62 = vld [vmem:[%s2462_s16 + $0xb4] sm:$0xf] }
  0x9e   : > { %v1579_v63 = vld [vmem:[%s2462_s16 + $0xcc] sm:$0xf0]  ;;  %v1549_v1 = vld [vmem:[%s2462_s16 + $0x78] sm:$0xf]  ;;  %v1793_v2 = vld [vmem:[%s2462_s16 + $0x90] sm:$0xf0]  ;;  %v1542_v3 = vor.u32 %v1792_v58, %v1541_v57 }
  0x9f   : > { %850 = vmatpush.bf16.msra.mxu0 %v1598_v43  ;;  %891 = vmatpush.bf16.msra.mxu3 %v1638_v44  ;;  %v1543_v0 = vld [vmem:[%s2462_s16 + $0x8c] sm:$0xf0]  ;;  %v1582_v4 = vor.u32 %v1797_v62, %v1579_v63  ;;  %v1513_v5 = vld [vmem:[%s2462_s16 + $0x38] sm:$0xf]  ;;  %v1785_v6 = vld [vmem:[%s2462_s16 + $0x50] sm:$0xf0]  ;;  %v1550_v8 = vor.u32 %v1793_v2, %v1549_v1 }
  0xa0   : > { %864 = vmatpush.bf16.msra.mxu1 %v1602_v47  ;;  %878 = vmatpush.bf16.msra.mxu2 %v1606_v48  ;;  %v1546_v7 = vor.u32 %v1789_v61, %v1543_v0  ;;  %v1782_v9 = vld [vmem:[%s2462_s16 + $0x3c] sm:$0xf]  ;;  %v1551_v11 = vld [vmem:[%s2462_s16 + $0x94] sm:$0xf0]  ;;  %v1521_v13 = vld [vmem:[%s2462_s16 + $0x40] sm:$0xf]  ;;  %v1514_v15 = vor.u32 %v1785_v6, %v1513_v5 }
  0xa1   : > { %v1790_v10 = vld [vmem:[%s2462_s16 + $0x7c] sm:$0xf]  ;;  %v1515_v12 = vld [vmem:[%s2462_s16 + $0x54] sm:$0xf0]  ;;  %v1485_v17 = vld [vmem:[%s2462_s16] sm:$0xf] }
  0xa2   : > { %v1786_v14 = vld [vmem:[%s2462_s16 + $0x58] sm:$0xf0]  ;;  %v1554_v16 = vor.u32 %v1790_v10, %v1551_v11  ;;  %v1775_v19 = vld [vmem:[%s2462_s16 + $0x4] sm:$0xf]  ;;  %v1518_v20 = vor.u32 %v1782_v9, %v1515_v12  ;;  %v1487_v22 = vld [vmem:[%s2462_s16 + $0x1c] sm:$0xf0] }
  0xa3   : > { %851 = vmatpush.bf16.msra.mxu0 %v1570_v55  ;;  %892 = vmatpush.bf16.msra.mxu3 %v1610_v56  ;;  %v1778_v18 = vld [vmem:[%s2462_s16 + $0x18] sm:$0xf0]  ;;  %v1522_v21 = vor.u32 %v1786_v14, %v1521_v13  ;;  %v1783_v23 = vld [vmem:[%s2462_s16 + $0x44] sm:$0xf]  ;;  %v1523_v24 = vld [vmem:[%s2462_s16 + $0x5c] sm:$0xf0]  ;;  %v1490_v36 = vor.u32 %v1775_v19, %v1487_v22 }
  0xa4   : > { %865 = vmatpush.bf16.msra.mxu1 %v1574_v59  ;;  %879 = vmatpush.bf16.msra.mxu2 %v1578_v60  ;;  %v1493_v25 = vld [vmem:[%s2462_s16 + $0x8] sm:$0xf]  ;;  %v1779_v26 = vld [vmem:[%s2462_s16 + $0x20] sm:$0xf0]  ;;  %v1697_v27 = vld [vmem:[%s2462_s16 + $0x198] sm:$0xf]  ;;  %v1486_v31 = vor.u32 %v1778_v18, %v1485_v17  ;;  %v1526_v35 = vor.u32 %v1783_v23, %v1523_v24 }
  0xa5   : > { %v1829_v28 = vld [vmem:[%s2462_s16 + $0x1b0] sm:$0xf0]  ;;  %v1826_v29 = vld [vmem:[%s2462_s16 + $0x19c] sm:$0xf]  ;;  %v1699_v30 = vld [vmem:[%s2462_s16 + $0x1b4] sm:$0xf0]  ;;  %v1494_v37 = vor.u32 %v1779_v26, %v1493_v25 }
  0xa6   : > { %v1705_v32 = vld [vmem:[%s2462_s16 + $0x1a0] sm:$0xf]  ;;  %v1830_v33 = vld [vmem:[%s2462_s16 + $0x1b8] sm:$0xf0]  ;;  %v2564_v34 = vld [vmem:[#allocation15] sm:$0xff]  ;;  %v1698_v41 = vor.u32 %v1829_v28, %v1697_v27  ;;  %v1702_v42 = vor.u32 %v1826_v29, %v1699_v30  ;;  %vm953_vm0 = vcmask 130048  }
  0xa7   : > { %852 = vmatpush.bf16.msra.mxu0 %v1542_v3  ;;  %893 = vmatpush.bf16.msra.mxu3 %v1582_v4  ;;  %v2566_v38 = vld [vmem:[#allocation15 + $0x8] sm:$0xff]  ;;  %v1495_v40 = vld [vmem:[%s2462_s16 + $0x24] sm:$0xf0]  ;;  %v1669_v43 = vld [vmem:[%s2462_s16 + $0x160] sm:$0xf]  ;;  %v1706_v44 = vor.u32 %v1830_v33, %v1705_v32  ;;  %s2242_s29 = smov [#allocation15]  }
  0xa8   : > { %866 = vmatpush.bf16.msra.mxu1 %v1546_v7  ;;  %880 = vmatpush.bf16.msra.mxu2 %v1550_v8  ;;  %v1776_v39 = vld [vmem:[%s2462_s16 + $0xc] sm:$0xf]  ;;  %v1822_v45 = vld [vmem:[%s2462_s16 + $0x178] sm:$0xf0]  ;;  %v1819_v46 = vld [vmem:[%s2462_s16 + $0x164] sm:$0xf]  ;;  %v2576_v48 = vpack.c.bf16 %v2566_v38, %v2564_v34 }
  0xa9   : > { %v1671_v47 = vld [vmem:[%s2462_s16 + $0x17c] sm:$0xf0]  ;;  %v1677_v49 = vld [vmem:[%s2462_s16 + $0x168] sm:$0xf]  ;;  %v1823_v50 = vld [vmem:[%s2462_s16 + $0x180] sm:$0xf0]  ;;  %v1498_v51 = vor.u32 %v1776_v39, %v1495_v40  ;;  %v1670_v52 = vor.u32 %v1822_v45, %v1669_v43 }
  0xaa   : > { %v1674_v53 = vor.u32 %v1819_v46, %v1671_v47  ;;  %v1641_v54 = vld [vmem:[%s2462_s16 + $0x128] sm:$0xf]  ;;  %v1678_v55 = vor.u32 %v1823_v50, %v1677_v49  ;;  %v1815_v56 = vld [vmem:[%s2462_s16 + $0x140] sm:$0xf0]  ;;  %v1812_v57 = vld [vmem:[%s2462_s16 + $0x12c] sm:$0xf] }
  0xab   : > { %853 = vmatpush.bf16.msra.mxu0 %v1514_v15  ;;  %894 = vmatpush.bf16.msra.mxu3 %v1554_v16  ;;  %v1643_v58 = vld [vmem:[%s2462_s16 + $0x144] sm:$0xf0]  ;;  %v1649_v59 = vld [vmem:[%s2462_s16 + $0x130] sm:$0xf]  ;;  %v1816_v60 = vld [vmem:[%s2462_s16 + $0x148] sm:$0xf0]  ;;  %v1642_v62 = vor.u32 %v1815_v56, %v1641_v54 }
  0xac   : > { %867 = vmatpush.bf16.msra.mxu1 %v1518_v20  ;;  %881 = vmatpush.bf16.msra.mxu2 %v1522_v21  ;;  %v1613_v61 = vld [vmem:[%s2462_s16 + $0xf0] sm:$0xf]  ;;  %v1646_v63 = vor.u32 %v1812_v57, %v1643_v58  ;;  %v1808_v0 = vld [vmem:[%s2462_s16 + $0x108] sm:$0xf0]  ;;  %v1805_v1 = vld [vmem:[%s2462_s16 + $0xf4] sm:$0xf]  ;;  %v1650_v3 = vor.u32 %v1816_v60, %v1649_v59 }
  0xad   : > { %v1615_v2 = vld [vmem:[%s2462_s16 + $0x10c] sm:$0xf0]  ;;  %v1621_v4 = vld [vmem:[%s2462_s16 + $0xf8] sm:$0xf]  ;;  %v1809_v5 = vld [vmem:[%s2462_s16 + $0x110] sm:$0xf0]  ;;  %v1614_v6 = vor.u32 %v1808_v0, %v1613_v61 }
  0xae   : > { %v1618_v7 = vor.u32 %v1805_v1, %v1615_v2  ;;  %v1585_v8 = vld [vmem:[%s2462_s16 + $0xb8] sm:$0xf]  ;;  %v1622_v9 = vor.u32 %v1809_v5, %v1621_v4  ;;  %v1801_v10 = vld [vmem:[%s2462_s16 + $0xd0] sm:$0xf0]  ;;  %v1798_v11 = vld [vmem:[%s2462_s16 + $0xbc] sm:$0xf] }
  0xaf   : > { %854 = vmatpush.bf16.msra.mxu0 %v1486_v31  ;;  %895 = vmatpush.bf16.msra.mxu3 %v1526_v35  ;;  %v1587_v12 = vld [vmem:[%s2462_s16 + $0xd4] sm:$0xf0]  ;;  %v1593_v13 = vld [vmem:[%s2462_s16 + $0xc0] sm:$0xf]  ;;  %v1802_v14 = vld [vmem:[%s2462_s16 + $0xd8] sm:$0xf0]  ;;  %v1586_v15 = vor.u32 %v1801_v10, %v1585_v8 }
  0xb0   : > { %868 = vmatpush.bf16.msra.mxu1 %v1490_v36  ;;  %882 = vmatpush.bf16.msra.mxu2 %v1494_v37  ;;  %v1590_v16 = vor.u32 %v1798_v11, %v1587_v12  ;;  %v1557_v17 = vld [vmem:[%s2462_s16 + $0x80] sm:$0xf]  ;;  %v1594_v18 = vor.u32 %v1802_v14, %v1593_v13  ;;  %v1794_v19 = vld [vmem:[%s2462_s16 + $0x98] sm:$0xf0]  ;;  %v1791_v20 = vld [vmem:[%s2462_s16 + $0x84] sm:$0xf] }
  0xb1   : > { %v1559_v21 = vld [vmem:[%s2462_s16 + $0x9c] sm:$0xf0]  ;;  %v1565_v22 = vld [vmem:[%s2462_s16 + $0x88] sm:$0xf]  ;;  %v1795_v23 = vld [vmem:[%s2462_s16 + $0xa0] sm:$0xf0]  ;;  %v1558_v24 = vor.u32 %v1794_v19, %v1557_v17 }
  0xb2   : > { %855 = vmatmul.bf16.vlgmr.msra.gmra.mxu0 %v2576_v48  ;;  %v1562_v25 = vor.u32 %v1791_v20, %v1559_v21  ;;  %v1529_v26 = vld [vmem:[%s2462_s16 + $0x48] sm:$0xf]  ;;  %v1566_v27 = vor.u32 %v1795_v23, %v1565_v22  ;;  %v1787_v28 = vld [vmem:[%s2462_s16 + $0x60] sm:$0xf0]  ;;  %v1784_v29 = vld [vmem:[%s2462_s16 + $0x4c] sm:$0xf] }
  0xb3   : > { %903 = vmatpush.bf16.msrb.mxu0 %v1698_v41  ;;  %869 = vmatmul.bf16.vlgmr.msra.gmra.mxu1 %v2576_v48  ;;  %v1531_v30 = vld [vmem:[%s2462_s16 + $0x64] sm:$0xf0]  ;;  %v1537_v31 = vld [vmem:[%s2462_s16 + $0x50] sm:$0xf]  ;;  %v1788_v32 = vld [vmem:[%s2462_s16 + $0x68] sm:$0xf0]  ;;  %v1530_v33 = vor.u32 %v1787_v28, %v1529_v26 }
  0xb4   : > { %917 = vmatpush.bf16.msrb.mxu1 %v1702_v42  ;;  %931 = vmatpush.bf16.msrb.mxu2 %v1706_v44  ;;  %v1534_v35 = vor.u32 %v1784_v29, %v1531_v30  ;;  %v1501_v36 = vld [vmem:[%s2462_s16 + $0x10] sm:$0xf]  ;;  %v1538_v37 = vor.u32 %v1788_v32, %v1537_v31  ;;  %v1780_v39 = vld [vmem:[%s2462_s16 + $0x28] sm:$0xf0]  ;;  %v1777_v40 = vld [vmem:[%s2462_s16 + $0x14] sm:$0xf] }
  0xb5   : > { %896 = vmatpush.bf16.msra.mxu3 %v1498_v51  ;;  %883 = vmatmul.bf16.vlgmr.msra.gmra.mxu2 %v2576_v48  ;;  %v1503_v41 = vld [vmem:[%s2462_s16 + $0x2c] sm:$0xf0]  ;;  %v1509_v42 = vld [vmem:[%s2462_s16 + $0x18] sm:$0xf]  ;;  %v1781_v43 = vld [vmem:[%s2462_s16 + $0x30] sm:$0xf0]  ;;  %v1502_v44 = vor.u32 %v1780_v39, %v1501_v36 }
  0xb6   : > { %v1506_v45 = vor.u32 %v1777_v40, %v1503_v41  ;;  %v1510_v46 = vor.u32 %v1781_v43, %v1509_v42  ;;  %v1831_v54 = vld [vmem:[#allocation2] sm:$0xff]  ;;  %v1833_v60 = vld [vmem:[#allocation2 + $0x10] sm:$0xff]  ;;  %v1834_v4 = vld [vmem:[#allocation2 + $0x18] sm:$0xff]  ;;  %v2241_v39 = vmov 0.0   ;;  %s1313_s30 = sshll.u32 %s2242_s29, 4  ;;  %s2701_s25 = sld [smem:[#allocation32_spill]]  ;;  %s1314_s30 = int_to_ptr.vmem [resolvable:$true] %s1313_s30 }
  0xb7   : > { %904 = vmatpush.bf16.msrb.mxu0 %v1670_v52  ;;  %v1835_v5 = vld [vmem:[#allocation2 + $0x20] sm:$0xff]  ;;  %v1836_v8 = vld [vmem:[#allocation2 + $0x28] sm:$0xff]  ;;  %p1889_p7 = scmp.eq.s32.totalorder %s2378_s13, 3  ;;  %s2243_s12 = smov 128  }
  0xb8   : > { %918 = vmatpush.bf16.msrb.mxu1 %v1674_v53  ;;  %932 = vmatpush.bf16.msrb.mxu2 %v1678_v55 }
  0xb9   : > { %897 = vmatmul.bf16.vlgmr.msra.gmra.mxu3 %v2576_v48 }
  0xbb   : > { %905 = vmatpush.bf16.msrb.mxu0 %v1642_v62 }
  0xbc   : > { %919 = vmatpush.bf16.msrb.mxu1 %v1646_v63  ;;  %933 = vmatpush.bf16.msrb.mxu2 %v1650_v3  ;;  %s1315_s16 = sshll.u32 %s2701_s25, 4  ;;  %s1316_s16 = int_to_ptr.hbm [resolvable:$true] %s1315_s16 }
  0xbf   : > { %906 = vmatpush.bf16.msrb.mxu0 %v1614_v6 }
  0xc0   : > { %920 = vmatpush.bf16.msrb.mxu1 %v1618_v7  ;;  %934 = vmatpush.bf16.msrb.mxu2 %v1622_v9 }
  0xc3   : > { %907 = vmatpush.bf16.msrb.mxu0 %v1586_v15 }
  0xc4   : > { %921 = vmatpush.bf16.msrb.mxu1 %v1590_v16  ;;  %935 = vmatpush.bf16.msrb.mxu2 %v1594_v18 }
  0xc7   : > { %908 = vmatpush.bf16.msrb.mxu0 %v1558_v24 }
  0xc8   : > { %922 = vmatpush.bf16.msrb.mxu1 %v1562_v25  ;;  %936 = vmatpush.bf16.msrb.mxu2 %v1566_v27 }
  0xcb   : > { %909 = vmatpush.bf16.msrb.mxu0 %v1530_v33  ;;  %v487_v33 = vlaneseq }
  0xcc   : > { %923 = vmatpush.bf16.msrb.mxu1 %v1534_v35  ;;  %937 = vmatpush.bf16.msrb.mxu2 %v1538_v37 }
  0xcd   : > { %v488_v35 = vand.u32 127, %v487_v33 }
  0xcf   : > { %910 = vmatpush.bf16.msrb.mxu0 %v1502_v44  ;;  %vm489_vm1 = vcmp.lt.s32.totalorder %v488_v35, 32 }
  0xd0   : > { %924 = vmatpush.bf16.msrb.mxu1 %v1506_v45  ;;  %938 = vmatpush.bf16.msrb.mxu2 %v1510_v46  ;;  %v2629_v40 = vsel %vm489_vm1, 1.0, %v2241_v39 }
  0xd2   : > { %911 = vmatmul.bf16.vlgmr.msrb.gmra.mxu0 %v2576_v48 }
  0xd3   : > { %925 = vmatmul.bf16.vlgmr.msrb.gmra.mxu1 %v2576_v48  ;;  %939 = vmatmul.bf16.vlgmr.msrb.gmra.mxu2 %v2576_v48  ;;  %v1832_v48 = vld [vmem:[#allocation2 + $0x8] sm:$0xff] }
 0x12f   : > { %v856_v52 = vpop.f32.mrf.mxu0 }
 0x130   : > { %v870_v47 = vpop.f32.mrf.mxu1 }
 0x137   : > { %v858_v59 = vpop.f32.mrf.mxu0 }
 0x138   : > { %v884_v49 = vpop.f32.mrf.mxu2  ;;  %v872_v50 = vpop.f32.mrf.mxu1 }
 0x139   : > { %v945_v51 = vpack.c.bf16 %v872_v50, %v870_v47  ;;  %v1844_v50 = vld [vmem:[%s2469_s0 + $0x38] sm:$0xff] }
 0x13a   : > { %1234 = vmatpush.bf16.msra.mxu0 %v1844_v50 }
 0x13b   : > { %964 = vmatpush.bf16.msrb.mxu3 %v945_v51  ;;  %v1843_v51 = vld [vmem:[%s2469_s0 + $0x30] sm:$0xff] }
 0x13c   : > { %v898_v53 = vpop.f32.mrf.mxu3 }
 0x13e   : > { %1711 = vmatmul.msk.bf16.vlgmr.msrb.gmra.mxu3 %vm953_vm0, %v1831_v54  ;;  %1235 = vmatpush.bf16.msra.mxu0 %v1843_v51  ;;  %v1840_v54 = vld [vmem:[%s2469_s0 + $0x18] sm:$0xff] }
 0x140   : > { %v886_v55 = vpop.f32.mrf.mxu2 }
 0x141   : > { %v973_v56 = vpack.c.bf16 %v886_v55, %v884_v49  ;;  %v1839_v55 = vld [vmem:[%s2469_s0 + $0x10] sm:$0xff] }
 0x143   : > { %992 = vmatpush.bf16.msra.mxu3 %v973_v56 }
 0x144   : > { %v900_v57 = vpop.f32.mrf.mxu3 }
 0x145   : > { %v1001_v58 = vpack.c.bf16 %v900_v57, %v898_v53  ;;  %v1841_v53 = vld [vmem:[%s2469_s0 + $0x20] sm:$0xff]  ;;  %v1838_v57 = vld [vmem:[%s2469_s0 + $0x8] sm:$0xff] }
 0x147   : > { %1020 = vmatpush.bf16.msra.mxu1 %v1001_v58 }
 0x14a   : > { %1721 = vmatmul.msk.bf16.vlgmr.msra.gmra.mxu1 %vm953_vm0, %v1833_v60 }
 0x14e   : > { %1716 = vmatmul.msk.bf16.vlgmr.msra.gmra.mxu3 %vm953_vm0, %v1832_v48 }
 0x14f   : > { %v912_v61 = vpop.f32.mrf.mxu0 }
 0x150   : > { %v926_v62 = vpop.f32.mrf.mxu1 }
 0x156   : > { %v940_v63 = vpop.f32.mrf.mxu2 }
 0x157   : > { %v914_v0 = vpop.f32.mrf.mxu0 }
 0x158   : > { %v928_v1 = vpop.f32.mrf.mxu1  ;;  %v1029_v2 = vpack.c.bf16 %v914_v0, %v912_v61 }
 0x159   : > { %v1057_v3 = vpack.c.bf16 %v928_v1, %v926_v62 }
 0x15a   : > { %1048 = vmatpush.bf16.msrb.mxu1 %v1029_v2 }
 0x15b   : > { %1076 = vmatpush.bf16.msra.mxu2 %v1057_v3 }
 0x15d   : > { %1726 = vmatmul.msk.bf16.vlgmr.msrb.gmra.mxu1 %vm953_vm0, %v1834_v4 }
 0x15e   : > { %1731 = vmatmul.msk.bf16.vlgmr.msra.gmra.mxu2 %vm953_vm0, %v1835_v5  ;;  %v942_v6 = vpop.f32.mrf.mxu2 }
 0x15f   : > { %v1085_v7 = vpack.c.bf16 %v942_v6, %v940_v63 }
 0x161   : > { %1104 = vmatpush.bf16.msrb.mxu3 %v1085_v7 }
 0x164   : > { %1736 = vmatmul.msk.bf16.vlgmr.msrb.gmra.mxu3 %vm953_vm0, %v1836_v8 }
 0x1c1   : > { %v966_v9 = vpop.f32.mrf.mxu3 }
 0x1c2   : > { %v971_v14 = vadd.f32 %v966_v9, %v856_v52  ;;  %v1842_v52 = vld [vmem:[%s2469_s0 + $0x28] sm:$0xff] }
 0x1c3   : > { %1236 = vmatpush.bf16.msra.mxu0 %v1842_v52 }
 0x1c7   : > { %v1022_v10 = vpop.f32.mrf.mxu1  ;;  %1237 = vmatpush.bf16.msra.mxu0 %v1841_v53  ;;  %v1937_v53 = vld [vmem:[%s401_s26] ss:$0 sm:$0xff] }
 0x1c9   : > { %v968_v11 = vpop.f32.mrf.mxu3 }
 0x1ca   : > { %v972_v20 = vadd.f32 %v968_v11, %v858_v59  ;;  %v1837_v59 = vld [vmem:[%s2469_s0] sm:$0xff]  ;;  %s2244_s0 = smov 8  }
 0x1cb   : > { %1238 = vmatpush.bf16.msra.mxu0 %v1840_v54 }
 0x1cf   : > { %v1024_v12 = vpop.f32.mrf.mxu1  ;;  %1239 = vmatpush.bf16.msra.mxu0 %v1839_v55 }
 0x1d1   : > { %v994_v13 = vpop.f32.mrf.mxu3 }
 0x1d2   : > { %v999_v15 = vadd.f32 %v994_v13, %v971_v14 }
 0x1d3   : > { %1240 = vmatpush.bf16.msra.mxu0 %v1838_v57 }
 0x1d4   : > { %v1027_v19 = vadd.f32 %v1022_v10, %v999_v15  ;;  %v1935_v10 = vld [vmem:[%s392_s24] ss:$0 sm:$0xff] }
 0x1d5   : > { %v1936_v15 = vld [vmem:[%s459_s9] ss:$0 sm:$0xff] }
 0x1d7   : > { %1241 = vmatpush.bf16.msra.mxu0 %v1837_v59 }
 0x1d9   : > { %v996_v17 = vpop.f32.mrf.mxu3 }
 0x1da   : > { %v1050_v16 = vpop.f32.mrf.mxu1  ;;  %v1000_v22 = vadd.f32 %v996_v17, %v972_v20 }
 0x1db   : > { %v1055_v21 = vadd.f32 %v1050_v16, %v1027_v19 }
 0x1dc   : > { %v1028_v27 = vadd.f32 %v1024_v12, %v1000_v22 }
 0x1e1   : > { %v1078_v18 = vpop.f32.mrf.mxu2 }
 0x1e2   : > { %v1083_v23 = vadd.f32 %v1078_v18, %v1055_v21  ;;  %v1052_v26 = vpop.f32.mrf.mxu1 }
 0x1e3   : > { %v1056_v29 = vadd.f32 %v1052_v26, %v1028_v27 }
 0x1e7   : > { %v1106_v24 = vpop.f32.mrf.mxu3 }
 0x1e8   : > { %v1111_v25 = vadd.f32 %v1106_v24, %v1083_v23 }
 0x1e9   : > { %v1080_v28 = vpop.f32.mrf.mxu2 }
 0x1ea   : > { %1115 = vadd.xlane.f32.xlu0 %v1111_v25  ;;  %v1084_v30 = vadd.f32 %v1080_v28, %v1056_v29 }
 0x1ef   : > { %v1108_v31 = vpop.f32.mrf.mxu3 }
 0x1f0   : > { %v1112_v32 = vadd.f32 %v1108_v31, %v1084_v30 }
 0x1f2   : > { %1117 = vadd.xlane.f32.xlu0 %v1112_v32 }
 0x25d   : > { %v1116_v36 = vpop.xlane.xlu0 %1115 }
 0x25e   : > { %v1119_v37 = vmul.f32 0.03125, %v1116_v36 }
 0x260   : > { %v1121_v41 = vsub.f32 %v1111_v25, %v1119_v37 }
 0x262   : > { %v1123_v42 = vmul.f32 %v2629_v40, %v1121_v41 }
 0x264   : > { %v1125_v43 = vmul.f32 %v1123_v42, %v1123_v42 }
 0x265   : > { %v1118_v44 = vpop.xlane.xlu0 %1117 }
 0x266   : > { %v1120_v45 = vmul.f32 0.03125, %v1118_v44  ;;  %1127 = vadd.xlane.f32.xlu1 %v1125_v43 }
 0x268   : > { %v1122_v46 = vsub.f32 %v1112_v32, %v1120_v45 }
 0x26a   : > { %v1124_v47 = vmul.f32 %v2629_v40, %v1122_v46 }
 0x26c   : > { %v1126_v49 = vmul.f32 %v1124_v47, %v1124_v47 }
 0x26e   : > { %1129 = vadd.xlane.f32.xlu1 %v1126_v49 }
 0x2d9   : > { %v1128_v56 = vpop.xlane.xlu1 %1127 }
 0x2da   : > { %v1131_v58 = vmul.f32 0.03125, %v1128_v56  ;;  %v1938_v56 = vld [vmem:[%s410_s17] ss:$0 sm:$0xff] }
 0x2dc   : > { %v1133_v60 = vadd.f32 1e-05, %v1131_v58 }
 0x2de   : > { %1939 = vrsqrt.f32 %v1133_v60  ;;  %vm1141_vm3 = vweird.f32 %v1133_v60 }
 0x2e1   : > { %v1130_v48 = vpop.xlane.xlu1 %1129 }
 0x2e2   : > { %v1132_v61 = vmul.f32 0.03125, %v1130_v48 }
 0x2e4   : > { %v1940_v62 = vpop.eup %1939  ;;  %v1134_v63 = vadd.f32 1e-05, %v1132_v61 }
 0x2e5   : > { %v1136_v0 = vmul.f32 %v1940_v62, %v1133_v60  ;;  %vm1142_vm2 = vweird.f32 %v1940_v62 }
 0x2e6   : > { %1941 = vrsqrt.f32 %v1134_v63  ;;  %vm1143_vm4 = vmor %vm1141_vm3, %vm1142_vm2  ;;  %vm1151_vm6 = vweird.f32 %v1134_v63 }
 0x2e7   : > { %v1137_v1 = vmul.f32 %v1940_v62, %v1136_v0 }
 0x2e9   : > { %v1138_v2 = vmul.f32 0.5, %v1137_v1 }
 0x2eb   : > { %v1139_v3 = vsub.f32 1.5, %v1138_v2 }
 0x2ec   : > { %v1942_v4 = vpop.eup %1941 }
 0x2ed   : > { %v1140_v5 = vmul.f32 %v1940_v62, %v1139_v3  ;;  %v1146_v6 = vmul.f32 %v1942_v4, %v1134_v63  ;;  %vm1152_vm5 = vweird.f32 %v1942_v4 }
 0x2ee   : > { %vm1153_vm7 = vmor %vm1151_vm6, %vm1152_vm5 }
 0x2ef   : > { %v1144_v7 = vsel %vm1143_vm4, %v1940_v62, %v1140_v5  ;;  %v1147_v8 = vmul.f32 %v1942_v4, %v1146_v6 }
 0x2f0   : > { %v1155_v11 = vmul.f32 %v1144_v7, %v1123_v42 }
 0x2f1   : > { %v1148_v9 = vmul.f32 0.5, %v1147_v8 }
 0x2f2   : > { %v1160_v14 = vmul.f32 %v1935_v10, %v1155_v11 }
 0x2f3   : > { %v1149_v12 = vsub.f32 1.5, %v1148_v9 }
 0x2f4   : > { %v1165_v19 = vadd.f32 %v1936_v15, %v1160_v14 }
 0x2f5   : > { %v1150_v13 = vmul.f32 %v1942_v4, %v1149_v12 }
 0x2f6   : > { %v1167_v21 = vmax.f32 %v1165_v19, 0.0 }
 0x2f7   : > { %v1154_v16 = vsel %vm1153_vm7, %v1942_v4, %v1150_v13 }
 0x2f8   : > { %v1156_v17 = vmul.f32 %v1154_v16, %v1124_v47 }
 0x2fa   : > { %v1161_v18 = vmul.f32 %v1935_v10, %v1156_v17 }
 0x2fc   : > { %v1166_v20 = vadd.f32 %v1936_v15, %v1161_v18 }
 0x2fe   : > { %v1168_v22 = vmax.f32 %v1166_v20, 0.0 }
 0x300   : > { %v1169_v23 = vpack.c.bf16 %v1168_v22, %v1167_v21 }
 0x302   : > { %1242 = vmatmul.bf16.vlgmr.msra.gmra.mxu0 %v1169_v23 }
 0x37f   : > { %v1243_v24 = vpop.f32.mrf.mxu0 }
 0x380   : > { %1250 = vadd.xlane.f32.xlu2 %v1243_v24 }
 0x387   : > { %v1245_v25 = vpop.f32.mrf.mxu0 }
 0x388   : > { %1252 = vadd.xlane.f32.xlu2 %v1245_v25 }
 0x3f3   : > { %v1251_v26 = vpop.xlane.xlu2 %1250 }
 0x3f4   : > { %v1254_v27 = vmul.f32 0.03125, %v1251_v26 }
 0x3f6   : > { %v1256_v28 = vsub.f32 %v1243_v24, %v1254_v27 }
 0x3f8   : > { %v1258_v29 = vmul.f32 %v2629_v40, %v1256_v28 }
 0x3fa   : > { %v1260_v30 = vmul.f32 %v1258_v29, %v1258_v29 }
 0x3fb   : > { %v1253_v31 = vpop.xlane.xlu2 %1252 }
 0x3fc   : > { %v1255_v32 = vmul.f32 0.03125, %v1253_v31  ;;  %1262 = vadd.xlane.f32.xlu0 %v1260_v30 }
 0x3fe   : > { %v1257_v33 = vsub.f32 %v1245_v25, %v1255_v32 }
 0x400   : > { %v1259_v35 = vmul.f32 %v2629_v40, %v1257_v33 }
 0x402   : > { %v1261_v36 = vmul.f32 %v1259_v35, %v1259_v35 }
 0x404   : > { %1264 = vadd.xlane.f32.xlu1 %v1261_v36 }
 0x46f   : > { %v1263_v37 = vpop.xlane.xlu0 %1262 }
 0x470   : > { %v1266_v39 = vmul.f32 0.03125, %v1263_v37 }
 0x472   : > { %v1268_v41 = vadd.f32 1e-05, %v1266_v39 }
 0x474   : > { %1943 = vrsqrt.f32 %v1268_v41  ;;  %vm1276_vm9 = vweird.f32 %v1268_v41 }
 0x477   : > { %v1265_v42 = vpop.xlane.xlu1 %1264 }
 0x478   : > { %v1267_v43 = vmul.f32 0.03125, %v1265_v42 }
 0x47a   : > { %v1944_v44 = vpop.eup %1943  ;;  %v1269_v45 = vadd.f32 1e-05, %v1267_v43 }
 0x47b   : > { %v1271_v46 = vmul.f32 %v1944_v44, %v1268_v41  ;;  %vm1277_vm8 = vweird.f32 %v1944_v44 }
 0x47c   : > { %1945 = vrsqrt.f32 %v1269_v45  ;;  %vm1278_vm10 = vmor %vm1276_vm9, %vm1277_vm8  ;;  %vm1286_vm12 = vweird.f32 %v1269_v45 }
 0x47d   : > { %v1272_v47 = vmul.f32 %v1944_v44, %v1271_v46 }
 0x47f   : > { %v1273_v49 = vmul.f32 0.5, %v1272_v47 }
 0x481   : > { %v1274_v50 = vsub.f32 1.5, %v1273_v49 }
 0x482   : > { %v1946_v51 = vpop.eup %1945 }
 0x483   : > { %v1275_v40 = vmul.f32 %v1944_v44, %v1274_v50  ;;  %v1281_v52 = vmul.f32 %v1946_v51, %v1269_v45  ;;  %vm1287_vm11 = vweird.f32 %v1946_v51 }
 0x484   : > { %vm1288_vm13 = vmor %vm1286_vm12, %vm1287_vm11 }
 0x485   : > { %v1279_v54 = vsel %vm1278_vm10, %v1944_v44, %v1275_v40  ;;  %v1282_v55 = vmul.f32 %v1946_v51, %v1281_v52 }
 0x486   : > { %v1290_v57 = vmul.f32 %v1279_v54, %v1258_v29 }
 0x487   : > { %v1283_v58 = vmul.f32 0.5, %v1282_v55 }
 0x488   : > { %v1295_v59 = vmul.f32 %v1937_v53, %v1290_v57 }
 0x489   : > { %v1284_v60 = vsub.f32 1.5, %v1283_v58 }
 0x48a   : > { %v1300_v48 = vadd.f32 %v1938_v56, %v1295_v59 }
 0x48b   : > { %v1285_v61 = vmul.f32 %v1946_v51, %v1284_v60 }
 0x48c   : > { %v1302_v62 = vadd.f32 %v1300_v48, %v2564_v34 }
 0x48d   : > { %v1289_v63 = vsel %vm1288_vm13, %v1946_v51, %v1285_v61 }
 0x48e   : > { %v1291_v0 = vmul.f32 %v1289_v63, %v1259_v35  ;;  %v1304_v1 = vmax.f32 %v1302_v62, 0.0 }
 0x490   : > { %v1296_v2 = vmul.f32 %v1937_v53, %v1291_v0  ;;  %1306 = vst [vmem:[#allocation15] sm:$0xff] %v1304_v1 }
 0x492   : > { %v1301_v3 = vadd.f32 %v1938_v56, %v1296_v2 }
 0x494   : > { %v1303_v4 = vadd.f32 %v1301_v3, %v2566_v38 }
 0x496   : > { %v1305_v5 = vmax.f32 %v1303_v4, 0.0 }
 0x498   : > { %1307 = vst [vmem:[#allocation15 + $0x8] sm:$0xff] %v1305_v5 }
 0x499   : > { %1863 = dma.vmem_to_hbm [thread:$0]  (%p1889_p7), %s1314_s30, 256, %s1316_s16, [#allocation6], %s2243_s12, %s2243_s12, %s2244_s0  }
 0x49a   : > { %2214 = dma.done.wait (%p1889_p7), [#allocation6], 256  }
 0x49b   : > { %2216 = vsyncadd (%p1889_p7), [#allocation6], 4294967040 }
 0x49c PF: > { %s2702_s30 = sld [smem:[#allocation27_spill]]  ;;  %s2705_s27 = smov %s2223_s28 }
 0x49d   : > { %s2703_s4 = sld [smem:[#allocation26_spill]] }
 0x49e   : > { %s2704_s29 = sld [smem:[#allocation28_spill]] }
 0x4a2   : > { %p26_p10 = scmp.ge.s32.totalorder %s2702_s30, 6  }
 0x4a3   : > { %s2706_s28 = smov %s2703_s4 }
 0x4a4   :  { %28 = sbr.rel (!%p26_p10) target bundleno = 14 (0xe), region = 154 }
 0x4a9   :  { %1332 = vsyncpa [#allocation5], 1 }
 0x4aa   :  { %1334 = vsyncpa [#allocation5 + $0x1], 1 }
 0x4ab   :  { %1335 = vsyncpa [#allocation8], 1 }
 0x4ac   :  { %1337 = vsyncpa [#allocation8 + $0x1], 1 }
 0x4ad   :  { %1338 = vsyncpa [#allocation11], 1 }
 0x4ae   :  { %1340 = vsyncpa [#allocation11 + $0x1], 1 }
 0x4af   :  { %1341 = vsyncpa [#allocation14], 1 }
 0x4b0   :  { %1343 = vsyncpa [#allocation14 + $0x1], 1 }
 0x4b1   :  { %1344 = vsyncpa [#allocation6], 1 }
 0x4b2   :  { %1346 = vsyncpa [#allocation6 + $0x1], 1 }
 0x4b3   :  { %1347 = vsyncmov [#allocation3] }
 0x4b6   :  { %s1348_s13 = vpop.sfrf %1347 }
 0x4b7   :  { %p1773_p13 = scmp.ne.s32.totalorder %s1348_s13, 0 }
 0x4b9   :  { %1352 = shalt.err (%p1773_p13)  }

</bundles_post_ra>
